<compile_context>
chip_gen: v6e
topology: v6e:2x2x1
jax: 0.10.0
libtpu: 0.0.40
codegen_flags: <defaults>
</compile_context>

<pallas_src>
import functools

import jax
import jax.numpy as jnp
import numpy as np
from jax.experimental import pallas as pl
from jax.experimental.pallas import tpu as pltpu


def _round_up(n, m):
    return ((n + m - 1) // m) * m


def _pad_axis(a, axis, target):
    pad = target - a.shape[axis]
    if pad <= 0:
        return a
    widths = [(0, 0)] * a.ndim
    widths[axis] = (0, pad)
    return jnp.pad(a, widths)


def _pad_gate_axis(a, hidden, hidden_p, axis):
    """Split a 4*hidden axis into its i,f,g,o gates and pad each gate to hidden_p."""
    if hidden_p == hidden:
        return a
    parts = []
    for k in range(4):
        p = jax.lax.slice_in_dim(a, k * hidden, (k + 1) * hidden, axis=axis)
        parts.append(_pad_axis(p, axis, hidden_p))
    return jnp.concatenate(parts, axis=axis)


def _vmem_limit(byte_estimate):
    # Explicit scoped-VMEM request sized to the actual resident tiles
    # (+50% / +2 MiB headroom, 16 MiB floor).  At the tile sizes chosen below
    # this stays comfortably under v7x's 64 MiB physical VMEM per TensorCore.
    return max(int(byte_estimate * 1.5) + (2 << 20), 16 << 20)


# --------------------------------------------------------------------------- #
# Kernel 1: chunked input projection + LSTM recurrence
#   grid = (batch_tiles [parallel], seq_chunks [arbitrary])
# --------------------------------------------------------------------------- #
def _lstm_chunk_kernel(x_ref, wih_ref, whh_ref, b_ref, hs_ref,
                       pre_ref, h_ref, c_ref, *, chunk, tb, hidden_p, emb_p):
    Hp = hidden_p
    s = pl.program_id(1)

    # New batch tile: reset the (h, c) carry.
    @pl.when(s == 0)
    def _():
        h_ref[...] = jnp.zeros_like(h_ref)
        c_ref[...] = jnp.zeros_like(c_ref)

    # Phase 0: pre-gates for the whole chunk as one lane-dense bf16 MXU matmul
    # (f32 accumulation) + bias, hoisted off the serial recurrence path.
    x2d = x_ref[...].reshape(chunk * tb, emb_p)
    pre_ref[...] = (
        jnp.dot(x2d, wih_ref[...], preferred_element_type=jnp.float32)
        + b_ref[...])

    whh = whh_ref[...]

    # Phase 1: serial recurrence over this chunk.  Per step: one skinny
    # (tb, Hp) @ (Hp, 4Hp) bf16 matmul + f32 VPU/EUP gate math.  Gate slices
    # are whole 128-lane tiles (Hp % 128 == 0), so they are free views.
    # TODO(synk): pin W_hh in MXU weight registers (pltpu.matmul_push_rhs /
    #             matmul_acc_lhs / matmul_pop) to avoid re-feeding weights
    #             every step of the skinny per-step matmul.
    def step(t, carry):
        h, c = carry
        row = pl.multiple_of(t * tb, tb)
        g = pre_ref[pl.ds(row, tb), :] + jnp.dot(
            h.astype(jnp.bfloat16), whh, preferred_element_type=jnp.float32)
        i_g = jax.nn.sigmoid(g[:, 0 * Hp:1 * Hp])
        f_g = jax.nn.sigmoid(g[:, 1 * Hp:2 * Hp])
        g_g = jnp.tanh(g[:, 2 * Hp:3 * Hp])
        o_g = jax.nn.sigmoid(g[:, 3 * Hp:4 * Hp])
        c_new = f_g * c + i_g * g_g
        h_new = o_g * jnp.tanh(c_new)
        hs_ref[t] = h_new.astype(hs_ref.dtype)
        return (h_new, c_new)

    # Bounded unroll: keeps LLO scheduling visibility without vreg spills /
    # compile-time blowup at long chunks.
    h_fin, c_fin = jax.lax.fori_loop(
        0, chunk, step, (h_ref[...], c_ref[...]), unroll=min(chunk, 4))
    h_ref[...] = h_fin
    c_ref[...] = c_fin


def lstm_recurrence(x_p, w_ih_p, w_hh_p, b_p, *, chunk, tb, hidden_p):
    seq_p, batch_pp, emb_p = x_p.shape
    n_bt = batch_pp // tb
    n_sc = seq_p // chunk
    kernel = functools.partial(_lstm_chunk_kernel, chunk=chunk, tb=tb,
                               hidden_p=hidden_p, emb_p=emb_p)
    vmem = _vmem_limit(
        2 * chunk * tb * emb_p * 2            # x chunk (bf16, double-buffered)
        + 2 * emb_p * 4 * hidden_p * 2        # W_ih^T (bf16)
        + 2 * hidden_p * 4 * hidden_p * 2     # W_hh^T (bf16)
        + 2 * 8 * 4 * hidden_p * 4            # bias (sublane-padded f32)
        + 2 * chunk * tb * hidden_p * 2       # h_t out chunk (bf16)
        + chunk * tb * 4 * hidden_p * 4       # pre-gate scratch (f32)
        + 2 * tb * hidden_p * 4)              # h/c carry scratch (f32)
    return pl.pallas_call(
        kernel,
        out_shape=jax.ShapeDtypeStruct((seq_p, batch_pp, hidden_p), jnp.bfloat16),
        grid_spec=pltpu.PrefetchScalarGridSpec(
            num_scalar_prefetch=0,
            grid=(n_bt, n_sc),
            in_specs=[
                pl.BlockSpec((chunk, tb, emb_p), lambda b, s: (s, b, 0)),         # x chunk
                pl.BlockSpec((emb_p, 4 * hidden_p), lambda b, s: (0, 0)),          # W_ih^T
                pl.BlockSpec((hidden_p, 4 * hidden_p), lambda b, s: (0, 0)),       # W_hh^T
                pl.BlockSpec((1, 4 * hidden_p), lambda b, s: (0, 0)),              # b_ih + b_hh
            ],
            out_specs=pl.BlockSpec((chunk, tb, hidden_p), lambda b, s: (s, b, 0)),  # h_t chunk
            scratch_shapes=[
                pltpu.VMEM((chunk * tb, 4 * hidden_p), jnp.float32),   # pre-gates (chunk)
                pltpu.VMEM((tb, hidden_p), jnp.float32),               # h carry
                pltpu.VMEM((tb, hidden_p), jnp.float32),               # c carry
            ],
        ),
        compiler_params=pltpu.CompilerParams(
            dimension_semantics=("parallel", "arbitrary"),
            vmem_limit_bytes=vmem),
    )(x_p, w_ih_p, w_hh_p, b_p)


# --------------------------------------------------------------------------- #
# Kernel 2: Linear + LogSoftmax, tiled over (rows, vocab)
#   pass 1: streaming logsumexp over vocab tiles (running max / running sum)
#   pass 2: recompute logits tile and write log-probs (fully parallel)
# --------------------------------------------------------------------------- #
def _lse_kernel(hs_ref, wlin_ref, blin_ref, lse_ref, m_sc, l_sc):
    j = pl.program_id(1)

    @pl.when(j == 0)
    def _():
        m_sc[...] = jnp.full_like(m_sc, -jnp.inf)
        l_sc[...] = jnp.zeros_like(l_sc)

    logits = (jnp.dot(hs_ref[...], wlin_ref[...],
                      preferred_element_type=jnp.float32) + blin_ref[...])
    m_prev = m_sc[...]
    m_new = jnp.maximum(m_prev, jnp.max(logits, axis=-1, keepdims=True))
    l_sc[...] = (l_sc[...] * jnp.exp(m_prev - m_new)
                 + jnp.sum(jnp.exp(logits - m_new), axis=-1, keepdims=True))
    m_sc[...] = m_new

    @pl.when(j == pl.num_programs(1) - 1)
    def _():
        lse_ref[...] = m_sc[...] + jnp.log(l_sc[...])


def _proj_out_kernel(hs_ref, wlin_ref, blin_ref, lse_ref, out_ref):
    logits = (jnp.dot(hs_ref[...], wlin_ref[...],
                      preferred_element_type=jnp.float32) + blin_ref[...])
    out_ref[...] = logits - lse_ref[...]


def output_projection(hs2d, w_lin_p, b_lin_p, *, tm, tv):
    rows_p, hidden_p = hs2d.shape
    vocab_pp = w_lin_p.shape[1]
    grid = (rows_p // tm, vocab_pp // tv)

    hs_spec = pl.BlockSpec((tm, hidden_p), lambda i, j: (i, 0))
    w_spec = pl.BlockSpec((hidden_p, tv), lambda i, j: (0, j))
    b_spec = pl.BlockSpec((1, tv), lambda i, j: (0, j))

    common = (2 * tm * hidden_p * 2          # hs tile (bf16)
              + 2 * hidden_p * tv * 2        # W_lin tile (bf16)
              + 2 * 8 * tv * 4)              # bias tile (f32, sublane-padded)

    # Pass 1: row-wise logsumexp, streaming over vocab tiles.
    lse = pl.pallas_call(
        _lse_kernel,
        out_shape=jax.ShapeDtypeStruct((rows_p, 1), jnp.float32),
        grid_spec=pltpu.PrefetchScalarGridSpec(
            num_scalar_prefetch=0, grid=grid,
            in_specs=[hs_spec, w_spec, b_spec],
            out_specs=pl.BlockSpec((tm, 1), lambda i, j: (i, 0)),
            scratch_shapes=[pltpu.VMEM((tm, 1), jnp.float32),
                            pltpu.VMEM((tm, 1), jnp.float32)],
        ),
        compiler_params=pltpu.CompilerParams(
            dimension_semantics=("parallel", "arbitrary"),
            vmem_limit_bytes=_vmem_limit(common + 6 * tm * 128 * 4)),
    )(hs2d, w_lin_p, b_lin_p)

    # Pass 2: recompute each logits tile and write lane-dense log-probs.
    out = pl.pallas_call(
        _proj_out_kernel,
        out_shape=jax.ShapeDtypeStruct((rows_p, vocab_pp), jnp.float32),
        grid_spec=pltpu.PrefetchScalarGridSpec(
            num_scalar_prefetch=0, grid=grid,
            in_specs=[hs_spec, w_spec, b_spec,
                      pl.BlockSpec((tm, 1), lambda i, j: (i, 0))],
            out_specs=pl.BlockSpec((tm, tv), lambda i, j: (i, j)),
        ),
        compiler_params=pltpu.CompilerParams(
            dimension_semantics=("parallel", "parallel"),
            vmem_limit_bytes=_vmem_limit(common + 2 * tm * 128 * 4
                                         + 2 * tm * tv * 4)),
    )(hs2d, w_lin_p, b_lin_p, lse)
    return out


# --------------------------------------------------------------------------- #
# Full Decoder.forward (teacher_forcing=False branch)
# --------------------------------------------------------------------------- #
def decoder_forward(phrase, enc_phrase, params, *,
                    seq_chunk=None, row_tile=None, vocab_tile=None):
    # phrase: (seq, batch) int32 token ids; enc_phrase: (1, batch, emb) f32
    # TODO(synk): fuse the embedding gather + concat into Kernel 1 via
    #             scalar-prefetched token ids to cut wrapper-side HBM passes.
    emb = params["emb_table"][phrase]                      # (seq, batch, emb)
    x = jnp.concatenate([enc_phrase, emb[:-1]], axis=0)    # (seq, batch, emb)
    seq, batch, emb_dim = x.shape
    hidden = params["w_hh_t"].shape[0]
    vocab = params["w_lin_t"].shape[1]

    # ---- (8, 128) vreg-tile geometry -------------------------------------- #
    emb_p = _round_up(emb_dim, 128)
    hidden_p = _round_up(hidden, 128)
    vocab_p = _round_up(vocab, 128)
    batch_p = _round_up(batch, 8)

    # Split the (batch-independent) recurrence into 2 batch tiles when batch is
    # big enough so v7x's two TensorCores both work; single tile otherwise.
    if batch_p >= 16:
        tb = _round_up(batch_p // 2, 8)
        batch_pp = 2 * tb
    else:
        tb = batch_p
        batch_pp = batch_p

    chunk = seq_chunk if seq_chunk is not None else min(16, seq)
    chunk = max(1, min(chunk, seq))
    seq_p = _round_up(seq, chunk)

    # ---- pad activations / weights; bf16 MXU operands, f32 accumulation ---- #
    # Padded hidden gates have zero weights/biases -> padded h/c stay exactly 0
    # through the recurrence; padded vocab columns get a -1e30 bias so the
    # log-softmax ignores them; padded batch rows / timesteps are sliced away.
    x_p = _pad_axis(_pad_axis(_pad_axis(x, 0, seq_p), 1, batch_pp), 2, emb_p)
    x_p = x_p.astype(jnp.bfloat16)

    w_ih_p = _pad_gate_axis(_pad_axis(params["w_ih_t"], 0, emb_p),
                            hidden, hidden_p, axis=1).astype(jnp.bfloat16)
    w_hh_p = _pad_gate_axis(_pad_axis(params["w_hh_t"], 0, hidden_p),
                            hidden, hidden_p, axis=1).astype(jnp.bfloat16)
    b_p = _pad_gate_axis(params["b"], hidden, hidden_p, axis=1).astype(jnp.float32)

    # Kernel 1: chunked input projection + LSTM recurrence -> bf16 h_t slab.
    hs = lstm_recurrence(x_p, w_ih_p, w_hh_p, b_p,
                         chunk=chunk, tb=tb, hidden_p=hidden_p)

    # Kernel 2 tiling: rows padded to the chosen row tile, vocab padded to the
    # chosen lane-dense vocab tile.  Defaults: tm=256 (fits all generations once
    # vocab is tiled), tv=2048.
    rows = seq_p * batch_pp
    tm = row_tile if row_tile is not None else (256 if rows >= 256 else rows)
    tm = min(tm, rows)
    assert tm % 8 == 0
    rows_p = _round_up(rows, tm)

    tv = vocab_tile if vocab_tile is not None else min(2048, vocab_p)
    assert tv % 128 == 0
    vocab_pp = _round_up(vocab_p, tv)

    hs2d = _pad_axis(hs.reshape(rows, hidden_p), 0, rows_p)

    w_lin_p = _pad_axis(_pad_axis(params["w_lin_t"], 0, hidden_p),
                        1, vocab_pp).astype(jnp.bfloat16)
    b_lin_p = params["b_lin"].astype(jnp.float32)
    if vocab_pp > vocab:
        b_lin_p = jnp.concatenate(
            [b_lin_p, jnp.full((1, vocab_pp - vocab), -1e30, jnp.float32)],
            axis=-1)

    out2d = output_projection(hs2d, w_lin_p, b_lin_p, tm=tm, tv=tv)
    out = out2d[:rows].reshape(seq_p, batch_pp, vocab_pp)[:seq, :batch, :vocab]
    return out


# --------------------------------------------------------------------------- #
# Pure-JAX reference (for correctness check)
# --------------------------------------------------------------------------- #
def decoder_forward_ref(phrase, enc_phrase, params):
    emb = params["emb_table"][phrase]
    x = jnp.concatenate([enc_phrase, emb[:-1]], axis=0)
    seq, batch, _ = x.shape
    H = params["w_hh_t"].shape[0]
    h = jnp.zeros((batch, H), jnp.float32)
    c = jnp.zeros((batch, H), jnp.float32)
    outs = []
    for t in range(seq):
        g = x[t] @ params["w_ih_t"] + h @ params["w_hh_t"] + params["b"]
        i = jax.nn.sigmoid(g[:, :H]); f = jax.nn.sigmoid(g[:, H:2 * H])
        gg = jnp.tanh(g[:, 2 * H:3 * H]); o = jax.nn.sigmoid(g[:, 3 * H:])
        c = f * c + i * gg
        h = o * jnp.tanh(c)
        logits = h @ params["w_lin_t"] + params["b_lin"]
        outs.append(jax.nn.log_softmax(logits, axis=-1))
    return jnp.stack(outs, axis=0)


# --------------------------------------------------------------------------- #
if __name__ == "__main__":
    # Small, deliberately non-(8,128)-aligned config that exercises every tiling
    # path: batch padding + 2 batch tiles, multi-chunk recurrence carry, hidden
    # padding, multiple vocab tiles (streaming logsumexp) and multiple row tiles.
    max_seq_len, vocab_sz, emb_dim, dec_rnn_dim, batch = 11, 300, 24, 40, 20

    key = jax.random.PRNGKey(0)
    k = jax.random.split(key, 8)

    params = {
        # nn.Embedding(vocab_sz, emb_dim)
        "emb_table": jax.random.normal(k[0], (vocab_sz, emb_dim), jnp.float32) * 0.1,
        # nn.LSTM(emb_dim, dec_rnn_dim): weight_ih (4H, emb) -> transposed; gates i,f,g,o
        "w_ih_t": jax.random.normal(k[1], (emb_dim, 4 * dec_rnn_dim), jnp.float32) * 0.1,
        "w_hh_t": jax.random.normal(k[2], (dec_rnn_dim, 4 * dec_rnn_dim), jnp.float32) * 0.1,
        "b": (jax.random.normal(k[3], (1, 4 * dec_rnn_dim), jnp.float32) * 0.1
              + jax.random.normal(k[4], (1, 4 * dec_rnn_dim), jnp.float32) * 0.1),
        # nn.Linear(dec_rnn_dim, vocab_sz): weight (vocab, H) -> transposed
        "w_lin_t": jax.random.normal(k[5], (dec_rnn_dim, vocab_sz), jnp.float32) * 0.1,
        "b_lin": jax.random.normal(k[6], (1, vocab_sz), jnp.float32) * 0.1,
    }

    phrase = jax.random.randint(k[7], (max_seq_len, batch), 0, vocab_sz, jnp.int32)
    enc_phrase = jax.random.normal(key, (1, batch, emb_dim), jnp.float32)

    out = jax.block_until_ready(
        decoder_forward(phrase, enc_phrase, params,
                        seq_chunk=4, row_tile=128, vocab_tile=128))
    ref = jax.block_until_ready(decoder_forward_ref(phrase, enc_phrase, params))

    assert out.shape == (max_seq_len, batch, vocab_sz)
    # bf16 MXU operands (f32 accumulation) -> looser tolerance than the pure-f32 ref.
    np.testing.assert_allclose(np.asarray(out), np.asarray(ref),
                               atol=3e-2, rtol=3e-2)
    print("KERNEL_OK")
</pallas_src>

<mosaic_0001>
module attributes {stable_mosaic.version = 11 : i64} {
  func.func @_lstm_chunk_kernel(%arg0: i32, %arg1: i32, %arg2: memref<4x16x128xbf16, #tpu.memory_space<vmem>>, %arg3: memref<128x512xbf16, #tpu.memory_space<vmem>>, %arg4: memref<128x512xbf16, #tpu.memory_space<vmem>>, %arg5: memref<1x512xf32, #tpu.memory_space<vmem>>, %arg6: memref<4x16x128xbf16, #tpu.memory_space<vmem>>, %arg7: memref<64x512xf32, #tpu.memory_space<vmem>>, %arg8: memref<16x128xf32, #tpu.memory_space<vmem>>, %arg9: memref<16x128xf32, #tpu.memory_space<vmem>>) attributes {dimension_semantics = [#tpu.dimension_semantics<parallel>, #tpu.dimension_semantics<arbitrary>], iteration_bounds = array<i64: 2, 3>, scalar_prefetch = 0 : i64, scratch_operands = 3 : i64, tpu.core_type = #tpu.core_type<tc>, window_params = [{transform_indices = @transform_0, window_bounds = array<i64: 4, 16, 128>}, {pipeline_mode = #tpu.pipeline_mode<synchronous>, transform_indices = @transform_1, window_bounds = array<i64: 128, 512>}, {pipeline_mode = #tpu.pipeline_mode<synchronous>, transform_indices = @transform_2, window_bounds = array<i64: 128, 512>}, {pipeline_mode = #tpu.pipeline_mode<synchronous>, transform_indices = @transform_3, window_bounds = array<i64: 1, 512>}, {transform_indices = @transform_4, window_bounds = array<i64: 4, 16, 128>}]} {
    %c0_i32 = arith.constant 0 : i32
    %0 = arith.cmpi eq, %arg1, %c0_i32 : i32
    %1 = arith.extui %0 : i1 to i32
    %c0_i32_0 = arith.constant 0 : i32
    %2 = arith.cmpi ne, %1, %c0_i32_0 : i32
    scf.if %2 {
      %cst_51 = arith.constant 0.000000e+00 : f32
      %164 = vector.broadcast %cst_51 : f32 to vector<16x128xf32>
      %c0_52 = arith.constant 0 : index
      %c0_53 = arith.constant 0 : index
      %165 = vector.load %arg8[%c0_52, %c0_53] : memref<16x128xf32, #tpu.memory_space<vmem>>, vector<16x128xf32>
      tpu.vector_store %arg8[%c0_52, %c0_53], %164 {strides = array<i32>} : memref<16x128xf32, #tpu.memory_space<vmem>>, vector<16x128xf32>,
      %cst_54 = arith.constant 0.000000e+00 : f32
      %166 = vector.broadcast %cst_54 : f32 to vector<16x128xf32>
      %c0_55 = arith.constant 0 : index
      %c0_56 = arith.constant 0 : index
      %167 = vector.load %arg9[%c0_55, %c0_56] : memref<16x128xf32, #tpu.memory_space<vmem>>, vector<16x128xf32>
      tpu.vector_store %arg9[%c0_55, %c0_56], %166 {strides = array<i32>} : memref<16x128xf32, #tpu.memory_space<vmem>>, vector<16x128xf32>,
    } else {
    }
    %c0 = arith.constant 0 : index
    %c0_1 = arith.constant 0 : index
    %c0_2 = arith.constant 0 : index
    %3 = vector.load %arg2[%c0, %c0_1, %c0_2] : memref<4x16x128xbf16, #tpu.memory_space<vmem>>, vector<4x16x128xbf16>
    %4 = vector.shape_cast %3 : vector<4x16x128xbf16> to vector<64x128xbf16>
    %c0_3 = arith.constant 0 : index
    %c0_4 = arith.constant 0 : index
    %5 = vector.load %arg3[%c0_3, %c0_4] : memref<128x512xbf16, #tpu.memory_space<vmem>>, vector<128x512xbf16>
    %cst = arith.constant dense<0.000000e+00> : vector<64x512xf32>
    %6 = tpu.matmul %4, %5, %cst {dimension_numbers = #tpu.dot_dimension_numbers<[1], [0], [0], [1], [0, 0, 1, 1], [], []>} : vector<64x128xbf16>, vector<128x512xbf16>, vector<64x512xf32> -> vector<64x512xf32>
    %c0_5 = arith.constant 0 : index
    %c0_6 = arith.constant 0 : index
    %7 = vector.load %arg5[%c0_5, %c0_6] : memref<1x512xf32, #tpu.memory_space<vmem>>, vector<1x512xf32>
    %8 = vector.broadcast %7 : vector<1x512xf32> to vector<64x512xf32>
    %9 = arith.addf %6, %8 : vector<64x512xf32>
    %c0_7 = arith.constant 0 : index
    %c0_8 = arith.constant 0 : index
    %10 = vector.load %arg7[%c0_7, %c0_8] : memref<64x512xf32, #tpu.memory_space<vmem>>, vector<64x512xf32>
    tpu.vector_store %arg7[%c0_7, %c0_8], %9 {strides = array<i32>} : memref<64x512xf32, #tpu.memory_space<vmem>>, vector<64x512xf32>,
    %c0_9 = arith.constant 0 : index
    %c0_10 = arith.constant 0 : index
    %11 = vector.load %arg4[%c0_9, %c0_10] : memref<128x512xbf16, #tpu.memory_space<vmem>>, vector<128x512xbf16>
    %c0_11 = arith.constant 0 : index
    %c0_12 = arith.constant 0 : index
    %12 = vector.load %arg8[%c0_11, %c0_12] : memref<16x128xf32, #tpu.memory_space<vmem>>, vector<16x128xf32>
    %c0_13 = arith.constant 0 : index
    %c0_14 = arith.constant 0 : index
    %13 = vector.load %arg9[%c0_13, %c0_14] : memref<16x128xf32, #tpu.memory_space<vmem>>, vector<16x128xf32>
    %c0_i32_15 = arith.constant 0 : i32
    %c16_i32 = arith.constant 16 : i32
    %14 = arith.muli %c0_i32_15, %c16_i32 : i32
    %15 = tpu.assume_multiple %14, 16 : i32
    %16 = arith.index_cast %15 : i32 to index
    %c0_16 = arith.constant 0 : index
    %17 = vector.load %arg7[%16, %c0_16] : memref<64x512xf32, #tpu.memory_space<vmem>>, vector<16x512xf32>
    %18 = arith.truncf %12 : vector<16x128xf32> to vector<16x128xbf16>
    %cst_17 = arith.constant dense<0.000000e+00> : vector<16x512xf32>
    %19 = tpu.matmul %18, %11, %cst_17 {dimension_numbers = #tpu.dot_dimension_numbers<[1], [0], [0], [1], [0, 0, 1, 1], [], []>} : vector<16x128xbf16>, vector<128x512xbf16>, vector<16x512xf32> -> vector<16x512xf32>
    %20 = arith.addf %17, %19 : vector<16x512xf32>
    %21 = vector.extract_strided_slice %20 {offsets = [0, 0], sizes = [16, 128], strides = [1, 1]} : vector<16x512xf32> to vector<16x128xf32>
    %22 = arith.negf %21 : vector<16x128xf32>
    %23 = math.exp %22 : vector<16x128xf32>
    %cst_18 = arith.constant 1.000000e+00 : f32
    %24 = vector.broadcast %cst_18 : f32 to vector<16x128xf32>
    %25 = arith.addf %24, %23 : vector<16x128xf32>
    %26 = arith.divf %24, %25 : vector<16x128xf32>
    %27 = vector.extract_strided_slice %20 {offsets = [0, 128], sizes = [16, 128], strides = [1, 1]} : vector<16x512xf32> to vector<16x128xf32>
    %28 = arith.negf %27 : vector<16x128xf32>
    %29 = math.exp %28 : vector<16x128xf32>
    %cst_19 = arith.constant 1.000000e+00 : f32
    %30 = vector.broadcast %cst_19 : f32 to vector<16x128xf32>
    %31 = arith.addf %30, %29 : vector<16x128xf32>
    %32 = arith.divf %30, %31 : vector<16x128xf32>
    %33 = vector.extract_strided_slice %20 {offsets = [0, 256], sizes = [16, 128], strides = [1, 1]} : vector<16x512xf32> to vector<16x128xf32>
    %34 = math.tanh %33 : vector<16x128xf32>
    %35 = vector.extract_strided_slice %20 {offsets = [0, 384], sizes = [16, 128], strides = [1, 1]} : vector<16x512xf32> to vector<16x128xf32>
    %36 = arith.negf %35 : vector<16x128xf32>
    %37 = math.exp %36 : vector<16x128xf32>
    %cst_20 = arith.constant 1.000000e+00 : f32
    %38 = vector.broadcast %cst_20 : f32 to vector<16x128xf32>
    %39 = arith.addf %38, %37 : vector<16x128xf32>
    %40 = arith.divf %38, %39 : vector<16x128xf32>
    %41 = arith.mulf %32, %13 : vector<16x128xf32>
    %42 = arith.mulf %26, %34 : vector<16x128xf32>
    %43 = arith.addf %41, %42 : vector<16x128xf32>
    %44 = math.tanh %43 : vector<16x128xf32>
    %45 = arith.mulf %40, %44 : vector<16x128xf32>
    %46 = arith.truncf %45 : vector<16x128xf32> to vector<16x128xbf16>
    %47 = arith.index_cast %c0_i32_15 : i32 to index
    %c0_21 = arith.constant 0 : index
    %c0_22 = arith.constant 0 : index
    %48 = vector.load %arg6[%47, %c0_21, %c0_22] : memref<4x16x128xbf16, #tpu.memory_space<vmem>>, vector<1x16x128xbf16>
    %49 = vector.shape_cast %48 : vector<1x16x128xbf16> to vector<16x128xbf16>
    %50 = vector.shape_cast %46 : vector<16x128xbf16> to vector<1x16x128xbf16>
    tpu.vector_store %arg6[%47, %c0_21, %c0_22], %50 {strides = array<i32>} : memref<4x16x128xbf16, #tpu.memory_space<vmem>>, vector<1x16x128xbf16>,
    %c1_i32 = arith.constant 1 : i32
    %c16_i32_23 = arith.constant 16 : i32
    %51 = arith.muli %c1_i32, %c16_i32_23 : i32
    %52 = tpu.assume_multiple %51, 16 : i32
    %53 = arith.index_cast %52 : i32 to index
    %c0_24 = arith.constant 0 : index
    %54 = vector.load %arg7[%53, %c0_24] : memref<64x512xf32, #tpu.memory_space<vmem>>, vector<16x512xf32>
    %55 = arith.truncf %45 : vector<16x128xf32> to vector<16x128xbf16>
    %cst_25 = arith.constant dense<0.000000e+00> : vector<16x512xf32>
    %56 = tpu.matmul %55, %11, %cst_25 {dimension_numbers = #tpu.dot_dimension_numbers<[1], [0], [0], [1], [0, 0, 1, 1], [], []>} : vector<16x128xbf16>, vector<128x512xbf16>, vector<16x512xf32> -> vector<16x512xf32>
    %57 = arith.addf %54, %56 : vector<16x512xf32>
    %58 = vector.extract_strided_slice %57 {offsets = [0, 0], sizes = [16, 128], strides = [1, 1]} : vector<16x512xf32> to vector<16x128xf32>
    %59 = arith.negf %58 : vector<16x128xf32>
    %60 = math.exp %59 : vector<16x128xf32>
    %cst_26 = arith.constant 1.000000e+00 : f32
    %61 = vector.broadcast %cst_26 : f32 to vector<16x128xf32>
    %62 = arith.addf %61, %60 : vector<16x128xf32>
    %63 = arith.divf %61, %62 : vector<16x128xf32>
    %64 = vector.extract_strided_slice %57 {offsets = [0, 128], sizes = [16, 128], strides = [1, 1]} : vector<16x512xf32> to vector<16x128xf32>
    %65 = arith.negf %64 : vector<16x128xf32>
    %66 = math.exp %65 : vector<16x128xf32>
    %cst_27 = arith.constant 1.000000e+00 : f32
    %67 = vector.broadcast %cst_27 : f32 to vector<16x128xf32>
    %68 = arith.addf %67, %66 : vector<16x128xf32>
    %69 = arith.divf %67, %68 : vector<16x128xf32>
    %70 = vector.extract_strided_slice %57 {offsets = [0, 256], sizes = [16, 128], strides = [1, 1]} : vector<16x512xf32> to vector<16x128xf32>
    %71 = math.tanh %70 : vector<16x128xf32>
    %72 = vector.extract_strided_slice %57 {offsets = [0, 384], sizes = [16, 128], strides = [1, 1]} : vector<16x512xf32> to vector<16x128xf32>
    %73 = arith.negf %72 : vector<16x128xf32>
    %74 = math.exp %73 : vector<16x128xf32>
    %cst_28 = arith.constant 1.000000e+00 : f32
    %75 = vector.broadcast %cst_28 : f32 to vector<16x128xf32>
    %76 = arith.addf %75, %74 : vector<16x128xf32>
    %77 = arith.divf %75, %76 : vector<16x128xf32>
    %78 = arith.mulf %69, %43 : vector<16x128xf32>
    %79 = arith.mulf %63, %71 : vector<16x128xf32>
    %80 = arith.addf %78, %79 : vector<16x128xf32>
    %81 = math.tanh %80 : vector<16x128xf32>
    %82 = arith.mulf %77, %81 : vector<16x128xf32>
    %83 = arith.truncf %82 : vector<16x128xf32> to vector<16x128xbf16>
    %84 = arith.index_cast %c1_i32 : i32 to index
    %c0_29 = arith.constant 0 : index
    %c0_30 = arith.constant 0 : index
    %85 = vector.load %arg6[%84, %c0_29, %c0_30] : memref<4x16x128xbf16, #tpu.memory_space<vmem>>, vector<1x16x128xbf16>
    %86 = vector.shape_cast %85 : vector<1x16x128xbf16> to vector<16x128xbf16>
    %87 = vector.shape_cast %83 : vector<16x128xbf16> to vector<1x16x128xbf16>
    tpu.vector_store %arg6[%84, %c0_29, %c0_30], %87 {strides = array<i32>} : memref<4x16x128xbf16, #tpu.memory_space<vmem>>, vector<1x16x128xbf16>,
    %c2_i32 = arith.constant 2 : i32
    %c16_i32_31 = arith.constant 16 : i32
    %88 = arith.muli %c2_i32, %c16_i32_31 : i32
    %89 = tpu.assume_multiple %88, 16 : i32
    %90 = arith.index_cast %89 : i32 to index
    %c0_32 = arith.constant 0 : index
    %91 = vector.load %arg7[%90, %c0_32] : memref<64x512xf32, #tpu.memory_space<vmem>>, vector<16x512xf32>
    %92 = arith.truncf %82 : vector<16x128xf32> to vector<16x128xbf16>
    %cst_33 = arith.constant dense<0.000000e+00> : vector<16x512xf32>
    %93 = tpu.matmul %92, %11, %cst_33 {dimension_numbers = #tpu.dot_dimension_numbers<[1], [0], [0], [1], [0, 0, 1, 1], [], []>} : vector<16x128xbf16>, vector<128x512xbf16>, vector<16x512xf32> -> vector<16x512xf32>
    %94 = arith.addf %91, %93 : vector<16x512xf32>
    %95 = vector.extract_strided_slice %94 {offsets = [0, 0], sizes = [16, 128], strides = [1, 1]} : vector<16x512xf32> to vector<16x128xf32>
    %96 = arith.negf %95 : vector<16x128xf32>
    %97 = math.exp %96 : vector<16x128xf32>
    %cst_34 = arith.constant 1.000000e+00 : f32
    %98 = vector.broadcast %cst_34 : f32 to vector<16x128xf32>
    %99 = arith.addf %98, %97 : vector<16x128xf32>
    %100 = arith.divf %98, %99 : vector<16x128xf32>
    %101 = vector.extract_strided_slice %94 {offsets = [0, 128], sizes = [16, 128], strides = [1, 1]} : vector<16x512xf32> to vector<16x128xf32>
    %102 = arith.negf %101 : vector<16x128xf32>
    %103 = math.exp %102 : vector<16x128xf32>
    %cst_35 = arith.constant 1.000000e+00 : f32
    %104 = vector.broadcast %cst_35 : f32 to vector<16x128xf32>
    %105 = arith.addf %104, %103 : vector<16x128xf32>
    %106 = arith.divf %104, %105 : vector<16x128xf32>
    %107 = vector.extract_strided_slice %94 {offsets = [0, 256], sizes = [16, 128], strides = [1, 1]} : vector<16x512xf32> to vector<16x128xf32>
    %108 = math.tanh %107 : vector<16x128xf32>
    %109 = vector.extract_strided_slice %94 {offsets = [0, 384], sizes = [16, 128], strides = [1, 1]} : vector<16x512xf32> to vector<16x128xf32>
    %110 = arith.negf %109 : vector<16x128xf32>
    %111 = math.exp %110 : vector<16x128xf32>
    %cst_36 = arith.constant 1.000000e+00 : f32
    %112 = vector.broadcast %cst_36 : f32 to vector<16x128xf32>
    %113 = arith.addf %112, %111 : vector<16x128xf32>
    %114 = arith.divf %112, %113 : vector<16x128xf32>
    %115 = arith.mulf %106, %80 : vector<16x128xf32>
    %116 = arith.mulf %100, %108 : vector<16x128xf32>
    %117 = arith.addf %115, %116 : vector<16x128xf32>
    %118 = math.tanh %117 : vector<16x128xf32>
    %119 = arith.mulf %114, %118 : vector<16x128xf32>
    %120 = arith.truncf %119 : vector<16x128xf32> to vector<16x128xbf16>
    %121 = arith.index_cast %c2_i32 : i32 to index
    %c0_37 = arith.constant 0 : index
    %c0_38 = arith.constant 0 : index
    %122 = vector.load %arg6[%121, %c0_37, %c0_38] : memref<4x16x128xbf16, #tpu.memory_space<vmem>>, vector<1x16x128xbf16>
    %123 = vector.shape_cast %122 : vector<1x16x128xbf16> to vector<16x128xbf16>
    %124 = vector.shape_cast %120 : vector<16x128xbf16> to vector<1x16x128xbf16>
    tpu.vector_store %arg6[%121, %c0_37, %c0_38], %124 {strides = array<i32>} : memref<4x16x128xbf16, #tpu.memory_space<vmem>>, vector<1x16x128xbf16>,
    %c3_i32 = arith.constant 3 : i32
    %c16_i32_39 = arith.constant 16 : i32
    %125 = arith.muli %c3_i32, %c16_i32_39 : i32
    %126 = tpu.assume_multiple %125, 16 : i32
    %127 = arith.index_cast %126 : i32 to index
    %c0_40 = arith.constant 0 : index
    %128 = vector.load %arg7[%127, %c0_40] : memref<64x512xf32, #tpu.memory_space<vmem>>, vector<16x512xf32>
    %129 = arith.truncf %119 : vector<16x128xf32> to vector<16x128xbf16>
    %cst_41 = arith.constant dense<0.000000e+00> : vector<16x512xf32>
    %130 = tpu.matmul %129, %11, %cst_41 {dimension_numbers = #tpu.dot_dimension_numbers<[1], [0], [0], [1], [0, 0, 1, 1], [], []>} : vector<16x128xbf16>, vector<128x512xbf16>, vector<16x512xf32> -> vector<16x512xf32>
    %131 = arith.addf %128, %130 : vector<16x512xf32>
    %132 = vector.extract_strided_slice %131 {offsets = [0, 0], sizes = [16, 128], strides = [1, 1]} : vector<16x512xf32> to vector<16x128xf32>
    %133 = arith.negf %132 : vector<16x128xf32>
    %134 = math.exp %133 : vector<16x128xf32>
    %cst_42 = arith.constant 1.000000e+00 : f32
    %135 = vector.broadcast %cst_42 : f32 to vector<16x128xf32>
    %136 = arith.addf %135, %134 : vector<16x128xf32>
    %137 = arith.divf %135, %136 : vector<16x128xf32>
    %138 = vector.extract_strided_slice %131 {offsets = [0, 128], sizes = [16, 128], strides = [1, 1]} : vector<16x512xf32> to vector<16x128xf32>
    %139 = arith.negf %138 : vector<16x128xf32>
    %140 = math.exp %139 : vector<16x128xf32>
    %cst_43 = arith.constant 1.000000e+00 : f32
    %141 = vector.broadcast %cst_43 : f32 to vector<16x128xf32>
    %142 = arith.addf %141, %140 : vector<16x128xf32>
    %143 = arith.divf %141, %142 : vector<16x128xf32>
    %144 = vector.extract_strided_slice %131 {offsets = [0, 256], sizes = [16, 128], strides = [1, 1]} : vector<16x512xf32> to vector<16x128xf32>
    %145 = math.tanh %144 : vector<16x128xf32>
    %146 = vector.extract_strided_slice %131 {offsets = [0, 384], sizes = [16, 128], strides = [1, 1]} : vector<16x512xf32> to vector<16x128xf32>
    %147 = arith.negf %146 : vector<16x128xf32>
    %148 = math.exp %147 : vector<16x128xf32>
    %cst_44 = arith.constant 1.000000e+00 : f32
    %149 = vector.broadcast %cst_44 : f32 to vector<16x128xf32>
    %150 = arith.addf %149, %148 : vector<16x128xf32>
    %151 = arith.divf %149, %150 : vector<16x128xf32>
    %152 = arith.mulf %143, %117 : vector<16x128xf32>
    %153 = arith.mulf %137, %145 : vector<16x128xf32>
    %154 = arith.addf %152, %153 : vector<16x128xf32>
    %155 = math.tanh %154 : vector<16x128xf32>
    %156 = arith.mulf %151, %155 : vector<16x128xf32>
    %157 = arith.truncf %156 : vector<16x128xf32> to vector<16x128xbf16>
    %158 = arith.index_cast %c3_i32 : i32 to index
    %c0_45 = arith.constant 0 : index
    %c0_46 = arith.constant 0 : index
    %159 = vector.load %arg6[%158, %c0_45, %c0_46] : memref<4x16x128xbf16, #tpu.memory_space<vmem>>, vector<1x16x128xbf16>
    %160 = vector.shape_cast %159 : vector<1x16x128xbf16> to vector<16x128xbf16>
    %161 = vector.shape_cast %157 : vector<16x128xbf16> to vector<1x16x128xbf16>
    tpu.vector_store %arg6[%158, %c0_45, %c0_46], %161 {strides = array<i32>} : memref<4x16x128xbf16, #tpu.memory_space<vmem>>, vector<1x16x128xbf16>,
    %c4_i32 = arith.constant 4 : i32
    %c0_47 = arith.constant 0 : index
    %c0_48 = arith.constant 0 : index
    %162 = vector.load %arg8[%c0_47, %c0_48] : memref<16x128xf32, #tpu.memory_space<vmem>>, vector<16x128xf32>
    tpu.vector_store %arg8[%c0_47, %c0_48], %156 {strides = array<i32>} : memref<16x128xf32, #tpu.memory_space<vmem>>, vector<16x128xf32>,
    %c0_49 = arith.constant 0 : index
    %c0_50 = arith.constant 0 : index
    %163 = vector.load %arg9[%c0_49, %c0_50] : memref<16x128xf32, #tpu.memory_space<vmem>>, vector<16x128xf32>
    tpu.vector_store %arg9[%c0_49, %c0_50], %154 {strides = array<i32>} : memref<16x128xf32, #tpu.memory_space<vmem>>, vector<16x128xf32>,
    return
  }
  func.func @transform_0(%arg0: i32, %arg1: i32) -> (i32, i32, i32) {
    %c0_i32 = arith.constant 0 : i32
    %c0_i32_0 = arith.constant 0 : i32
    return %arg1, %arg0, %c0_i32 : i32, i32, i32
  }
  func.func @transform_1(%arg0: i32, %arg1: i32) -> (i32, i32) {
    %c0_i32 = arith.constant 0 : i32
    %c0_i32_0 = arith.constant 0 : i32
    %c0_i32_1 = arith.constant 0 : i32
    return %c0_i32, %c0_i32_0 : i32, i32
  }
  func.func @transform_2(%arg0: i32, %arg1: i32) -> (i32, i32) {
    %c0_i32 = arith.constant 0 : i32
    %c0_i32_0 = arith.constant 0 : i32
    %c0_i32_1 = arith.constant 0 : i32
    return %c0_i32, %c0_i32_0 : i32, i32
  }
  func.func @transform_3(%arg0: i32, %arg1: i32) -> (i32, i32) {
    %c0_i32 = arith.constant 0 : i32
    %c0_i32_0 = arith.constant 0 : i32
    %c0_i32_1 = arith.constant 0 : i32
    return %c0_i32, %c0_i32_0 : i32, i32
  }
  func.func @transform_4(%arg0: i32, %arg1: i32) -> (i32, i32, i32) {
    %c0_i32 = arith.constant 0 : i32
    %c0_i32_0 = arith.constant 0 : i32
    return %arg1, %arg0, %c0_i32 : i32, i32, i32
  }
}

</mosaic_0001>

<bundles_post_ra>
// kernel: tpu_custom_call.1
= control target key start
LH: loop header
LB: loop body
LE: loop exit
PB: predicated region body
PF: predicated region fallthrough
CT: control target
= control target key end

     0   :  { %s2990_s0 = inlined_call_operand.hbm [shape: bf16[12,32,128], index: 0, kind: input, shape index: {}]   ;;  %s2991_s1 = inlined_call_operand.hbm [shape: bf16[128,512], index: 1, kind: input, shape index: {}]   ;;  %s2992_s2 = inlined_call_operand.hbm [shape: bf16[128,512], index: 2, kind: input, shape index: {}]   ;;  %s2993_s3 = inlined_call_operand.vmem [shape: f32[1,512], index: 3, kind: input, shape index: {}]   ;;  %s2994_s4 = inlined_call_operand.hbm [shape: bf16[12,32,128], index: 4, kind: output, shape index: {}]  }
   0x1   :  { %3004 = sst [smem:[#allocation43_spill]] %s2991_s1 }
   0x2   :  { %3005 = sst [smem:[#allocation44_spill]] %s2992_s2 }
   0x3   :  { %9 = vsyncpa [#allocation6], 0 }
   0x4   :  { %11 = vsyncpa [#allocation6 + $0x1], 0 }
   0x5   :  { %12 = vsyncpa [#allocation9], 0 }
   0x6   :  { %13 = vsyncpa [#allocation7], 0 }
   0x7   :  { %15 = vsyncpa [#allocation7 + $0x1], 0  ;;  %s2423_s15 = smov 0   ;;  %s2425_s16 = smov 0  }
   0x8   :  { %s2427_s17 = smov 0   ;;  %s2429_s18 = smov 0  }
   0x9   :  { %s2431_s19 = smov 0   ;;  %s2433_s20 = smov 0  }
   0xa   :  { %s2435_s21 = smov 0   ;;  %s2437_s22 = smov 0  }
   0xb LB: > { %3006 = sst [smem:[#allocation20_spill]] %s2373_s21  ;;  %s1734_s23 = sadd.s32 4294967295, %s2377_s22   ;;  %s2377_s22 = sphi %s2437_s22, %s21_s22   ;;  %s2373_s21 = sphi %s2435_s21, %s3065_s21   ;;  %s2369_s20 = sphi %s2433_s20, %s3070_s20   ;;  %s2365_s19 = sphi %s2431_s19, %s3063_s19   ;;  %s2361_s18 = sphi %s2429_s18, %s3069_s18   ;;  %s2357_s17 = sphi %s2427_s17, %s3068_s17   ;;  %s2353_s16 = sphi %s2425_s16, %s3067_s16   ;;  %s2349_s15 = sphi %s2423_s15, %s3066_s15  }
   0xc   : > { %s1735_s24 = sadd.s32 4294967294, %s2377_s22   ;;  %s30_s25 = sadd.s32 1, %s2369_s20 }
   0xd   : > { %s33_s26 = sadd.s32 1, %s2373_s21  ;;  %p31_p0 = scmp.ge.s32.totalorder %s30_s25, 3 }
   0xe   : > { %s42_s27 = sadd.s32 1, %s2357_s17  ;;  %p49_p1 = scmp.ne.s32.totalorder %s2357_s17, %s2353_s16 }
   0xf   : > { %p50_p2 = scmp.eq.s32.totalorder %s2377_s22, 0  ;;  %s3072_s25 = smov (%p31_p0, %s30_s25), 0 }
  0x10   : > { %3007 = sst [smem:[#allocation21_spill]] %s3072_s25  ;;  %s3074_s26 = smov (!%p31_p0, %s33_s26), %s2373_s21 }
  0x11   : > { %s37_s28 = ssub.s32 %s2369_s20, %s3072_s25  ;;  %p2476_p3 = por %p50_p2, %p49_p1 }
  0x12   : > { %p35_p4 = scmp.ge.s32.totalorder %s3074_s26, 2  ;;  %p55_p5 = scmp.ne.s32.totalorder %s2353_s16, %s2349_s15 }
  0x13   : > { %p2482_p6 = scmp.eq.s32.totalorder %s1734_s23, 0  ;;  %p144_p7 = scmp.eq.s32.totalorder %s1734_s23, 5 }
  0x14   : > { %s3076_s26 = smov (%p35_p4, %s3074_s26), 0  ;;  %p150_p10 = scmp.eq.s32.totalorder %s1735_s24, 5 }
  0x15   : > { %s3009_s30 = scalar_select %p2482_p6, 1, 0 }
  0x16   : > { %3010 = sst [smem:[#allocation22_spill]] %s3076_s26  ;;  %p2490_p8 = por %p2482_p6, %p55_p5 }
  0x17   : > { %p2494_p9 = por %p144_p7, %p49_p1  ;;  %s38_s7 = ssub.s32 %s2373_s21, %s3076_s26 }
  0x18   : > { %s3011_s5 = scalar_select %p2490_p8, 1, 0 }
  0x19   : > { %s3012_s6 = scalar_select %p2494_p9, 1, 0 }
  0x1a   : > { %s39_s8 = sor.u32 %s38_s7, %s37_s28  ;;  %p1736_p11 = scmp.ge.s32.totalorder %s2377_s22, 1 }
  0x1b   : > { %p40_p12 = scmp.eq.s32.totalorder %s39_s8, 0  ;;  %p2501_p13 = por %p150_p10, %p55_p5 }
  0x1c   : > { %p157_p0 = scmp.lt.s32.totalorder %s2377_s22, 7  ;;  %s2379_s12 = smov [#allocation8]  }
  0x1d   : > { %s3013_s9 = scalar_select %p2501_p13, 1, 0 }
  0x1e   : > { %s2507_s10 = scalar_select %p40_p12, %s2357_s17, %s42_s27  }
  0x1f   : > { %p2509_p2 = pnand %p1736_p11, %p157_p0  ;;  %s169_s13 = sshll.u32 %s2379_s12, 4  ;;  %s170_s13 = int_to_ptr.vmem [resolvable:$true] %s169_s13 }
  0x20   : > { %s2380_s23 = smov [#allocation10]   ;;  %s2262_s27 = scalar_lea.vmem %s170_s13, 4096 }
  0x21   : > { %p1924_p1 = pneg %p2509_p2  ;;  %s182_s24 = sshll.u32 %s2380_s23, 4  ;;  %s183_s24 = int_to_ptr.vmem [resolvable:$true] %s182_s24 }
  0x22   : > { %p2263_p7 = scmp.ne.s32.totalorder %s170_s13, %s2262_s27  ;;  %p2270_p12 = scmp.lt.s32.totalorder %s170_s13, %s170_s13 }
  0x23   : > { %p2517_p4 = pnand %p1924_p1, %p2482_p6  ;;  %p2271_p0 = scmp.lt.s32.totalorder %s2262_s27, %s2262_s27 }
  0x25   : > { %p2253_p5 = pneg %p2517_p4  ;;  %p2272_p13 = por %p2271_p0, %p2270_p12 }
  0x27   : > { %p2265_p10 = pnand %p2263_p7, %p2253_p5 }
  0x29   : > { %p2266_p11 = pneg %p2265_p10 }
  0x2b   : > { %p2273_p1 = pnand %p2272_p13, %p2266_p11 }
  0x2d   : > { %2276 = shalt.err (!%p2273_p1)
}
  0x2e   : > { %s2381_s28 = smov 256   ;;  %s2382_s7 = smov 16  }
  0x2f   : > { %s3016_s1 = sld [smem:[#allocation43_spill]]  ;;  %s2288_s23 = scalar_lea.vmem %s183_s24, 4096 }
  0x30   : > { %p2289_p9 = scmp.ne.s32.totalorder %s183_s24, %s2288_s23  ;;  %p2296_p6 = scmp.lt.s32.totalorder %s183_s24, %s183_s24 }
  0x31   : > { %p2297_p8 = scmp.lt.s32.totalorder %s2288_s23, %s2288_s23 }
  0x32   : > { %p2291_p7 = pnand %p2289_p9, %p2253_p5 }
  0x33   : > { %p2298_p12 = por %p2297_p8, %p2296_p6 }
  0x34   : > { %p2292_p10 = pneg %p2291_p7 }
  0x35   : > { %1927 = dma.hbm_to_vmem [thread:$0]  (!%p2517_p4), %s3016_s1, 4096, %s170_s13, [#allocation9], %s2381_s28, %s2381_s28, %s2382_s7  }
  0x36   : > { %p2299_p13 = pnand %p2298_p12, %p2292_p10 }
  0x38   : > { %2302 = shalt.err (!%p2299_p13)
}
  0x39   : > { %s3017_s2 = sld [smem:[#allocation44_spill]]  ;;  %p1739_p11 = scmp.ge.s32.totalorder %s2377_s22, 6 }
  0x3b   : > { %195 = sbr.rel (%p1739_p11) target bundleno = 80 (0x50), region = 28 }
  0x3f   : > { %1930 = dma.hbm_to_vmem [thread:$0]  (!%p2517_p4), %s3017_s2, 4096, %s183_s24, [#allocation9], %s2381_s28, %s2381_s28, %s2382_s7  }
  0x40   : > { %s199_s13 = sand.u32 1, %s2357_s17   ;;  %s1742_s8 = sshll.u32 %s2373_s21, 1 }
  0x41   : > { %s1740_s12 = sshll.u32 %s199_s13, 5  ;;  %s1866_s23 = sshll.u32 %s2369_s20, 4 }
  0x42   : > { %s210_s14 = sadd.s32 %s1866_s23, %s1742_s8  ;;  %s203_s1 = scalar_lea.vmem [#allocation5], %s1740_s12 }
  0x43   : > { %s225_s26 = sshll.u32 %s203_s1, 4  ;;  %s1744_s24 = sshll.u32 %s210_s14, 6  ;;  %s226_s26 = int_to_ptr.vmem [resolvable:$true] %s225_s26 }
  0x44   : > { %s1903_s28 = scalar_select %p2476_p3, [#allocation0], [#allocation16] }
  0x45   : > { %s2383_s7 = smov 256   ;;  %s2384_s2 = smov 128  }
  0x46   : > { %1904 = sst [smem:[#allocation13]] (%p2476_p3), %s2383_s7  ;;  %s2385_s25 = smov 2  }
  0x47   : > { %s217_s27 = sld [smem:[%s1903_s28]]   ;;  %s2386_s8 = smov 64  }
  0x48   : > { %1905 = sst [smem:[#allocation13 + $0x1]] (%p2476_p3), %s2384_s2  ;;  %s212_s23 = scalar_lea.hbm %s2990_s0, %s1744_s24 }
  0x49   : > { %1906 = sst [smem:[#allocation13 + $0x2]] (%p2476_p3), %s2385_s25  ;;  %s2387_s14 = smov 4  }
  0x4a   : > { %1907 = sst [smem:[#allocation13 + $0x3]] (%p2476_p3), %s2386_s8  ;;  %s200_s21 = scalar_lea.sflag [#allocation6], %s199_s13 }
  0x4b   : > { %1908 = sst [smem:[#allocation13 + $0x4]] (%p2476_p3), %s2386_s8  ;;  %s2388_s2 = smov 131072  }
  0x4c   : > { %1909 = sst [smem:[#allocation13 + $0x5]] (%p2476_p3), %s2387_s14 }
  0x4d   : > { %s1745_s28 = sshll.u32 %s217_s27, 26 }
  0x4e   : > { %s1746_s7 = sadd.s32 134217728, %s1745_s28 }
  0x4f   : > { %1910 = dma.general (%p2476_p3), %s212_s23, 512, %s226_s26, %s200_s21, %s2388_s2, [#allocation13], %s1746_s7, 0  }
  0x50 PF: > { %250 = sbr.rel (%p2509_p2) target bundleno = 1201 (0x4b1), region = 36 }
  0x55   : > { %s2565_s25 = sand.u32 1, %s2353_s16   ;;  %p3018_p6 = scmp.ne.s32.totalorder %s3011_s5, 0 }
  0x56   : > { %s1748_s24 = sshll.u32 %s2565_s25, 5  ;;  %s253_s8 = scalar_lea.sflag [#allocation6], %s2565_s25 }
  0x57   : > { %s2569_s1 = scalar_lea.vmem [#allocation5], %s1748_s24 }
  0x58   : > { %2336 = dma.done.wait (%p3018_p6), %s253_s8, 512  }
  0x59   : > { %2338 = vsyncadd (%p3018_p6), %s253_s8, 4294966784  ;;  %p3019_p3 = scmp.ne.s32.totalorder %s3009_s30, 0 }
  0x5b   : > { %2340 = dma.done.wait (%p3019_p3), [#allocation9], 8192  }
  0x5c   : > { %2342 = vsyncadd (%p3019_p3), [#allocation9], 4294959104  ;;  %s2579_s21 = scalar_lea.vmem [#allocation11], %s1748_s24  ;;  %p1752_p8 = scmp.ne.s32.totalorder %s2361_s18, 0 }
  0x5e   : > { %297 = sbr.rel (%p1752_p8) target bundleno = 102 (0x66), region = 52 }
  0x63   : > { %v2389_v0 = vmov 0.0  }
  0x64   : > { %298 = vst [vmem:[#allocation3] sm:$0xff] %v2389_v0  ;;  %299 = vst [vmem:[#allocation3 + $0x8] sm:$0xff] %v2389_v0 }
  0x65   : > { %300 = vst [vmem:[#allocation4 + $0x8] sm:$0xff] %v2389_v0  ;;  %301 = vst [vmem:[#allocation4] sm:$0xff] %v2389_v0 }
  0x66 PF: > { %v2023_v1 = vld [vmem:[#allocation8 + $0xe4] ss:$16 sps:$4 sm:$0xff]   ;;  %v2025_v2 = vld [vmem:[#allocation8 + $0xec] ss:$16 sps:$4 sm:$0xff]   ;;  %v3002_v3 = vmov 0   ;;  %s1583_s5 = scalar_lea.sflag [#allocation7], %s2565_s25 }
  0x67   : > { %580 = vmatprep.mubr.bf16.mxu0 %v3002_v3  ;;  %653 = vmatprep.mubr.bf16.mxu1 %v3002_v3  ;;  %v2027_v4 = vld [vmem:[#allocation8 + $0xe0] ss:$16 sps:$4 sm:$0xff]   ;;  %v2028_v5 = vld [vmem:[#allocation8 + $0xe8] ss:$16 sps:$4 sm:$0xff]   ;;  %v2029_v6 = vld [vmem:[#allocation8 + $0xc4] ss:$16 sps:$4 sm:$0xff]  }
  0x68   : > { %548 = vmatprep.subr.bf16.mxu0 %v2023_v1  ;;  %621 = vmatprep.subr.bf16.mxu1 %v2025_v2  ;;  %v2031_v7 = vld [vmem:[#allocation8 + $0xcc] ss:$16 sps:$4 sm:$0xff]   ;;  %v2033_v8 = vld [vmem:[#allocation8 + $0xc0] ss:$16 sps:$4 sm:$0xff]   ;;  %v2034_v9 = vld [vmem:[#allocation8 + $0xc8] ss:$16 sps:$4 sm:$0xff]  }
  0x69   : > { %549 = vmatpush1.bf16.msra.mxu0 %v2027_v4  ;;  %622 = vmatpush1.bf16.msra.mxu1 %v2028_v5  ;;  %v2035_v10 = vld [vmem:[#allocation8 + $0xa4] ss:$16 sps:$4 sm:$0xff]   ;;  %v2037_v11 = vld [vmem:[#allocation8 + $0xac] ss:$16 sps:$4 sm:$0xff]   ;;  %v2039_v12 = vld [vmem:[#allocation8 + $0xa0] ss:$16 sps:$4 sm:$0xff]  }
  0x6a   : > { %550 = vmatprep.subr.bf16.mxu0 %v2029_v6  ;;  %623 = vmatprep.subr.bf16.mxu1 %v2031_v7  ;;  %v2040_v13 = vld [vmem:[#allocation8 + $0xa8] ss:$16 sps:$4 sm:$0xff]   ;;  %v2041_v14 = vld [vmem:[#allocation8 + $0x84] ss:$16 sps:$4 sm:$0xff]   ;;  %v2043_v15 = vld [vmem:[#allocation8 + $0x8c] ss:$16 sps:$4 sm:$0xff]  }
  0x6b   : > { %v2045_v16 = vld [vmem:[#allocation8 + $0x80] ss:$16 sps:$4 sm:$0xff]   ;;  %v2046_v17 = vld [vmem:[#allocation8 + $0x88] ss:$16 sps:$4 sm:$0xff]   ;;  %v2047_v18 = vld [vmem:[#allocation8 + $0x64] ss:$16 sps:$4 sm:$0xff]  }
  0x6c   : > { %v2049_v19 = vld [vmem:[#allocation8 + $0x6c] ss:$16 sps:$4 sm:$0xff]   ;;  %v2051_v20 = vld [vmem:[#allocation8 + $0x60] ss:$16 sps:$4 sm:$0xff]   ;;  %v2052_v21 = vld [vmem:[#allocation8 + $0x68] ss:$16 sps:$4 sm:$0xff]  }
  0x6d   : > { %551 = vmatpush1.bf16.msra.mxu0 %v2033_v8  ;;  %624 = vmatpush1.bf16.msra.mxu1 %v2034_v9  ;;  %v2053_v22 = vld [vmem:[#allocation8 + $0x44] ss:$16 sps:$4 sm:$0xff]   ;;  %v2055_v23 = vld [vmem:[#allocation8 + $0x4c] ss:$16 sps:$4 sm:$0xff]   ;;  %v2057_v24 = vld [vmem:[#allocation8 + $0x40] ss:$16 sps:$4 sm:$0xff]  }
  0x6e   : > { %552 = vmatprep.subr.bf16.mxu0 %v2035_v10  ;;  %625 = vmatprep.subr.bf16.mxu1 %v2037_v11  ;;  %v2058_v25 = vld [vmem:[#allocation8 + $0x48] ss:$16 sps:$4 sm:$0xff]   ;;  %v2059_v26 = vld [vmem:[#allocation8 + $0x24] ss:$16 sps:$4 sm:$0xff]   ;;  %v2061_v27 = vld [vmem:[#allocation8 + $0x2c] ss:$16 sps:$4 sm:$0xff]   ;;  %v344_v10 = vlaneseq }
  0x6f   : > { %v2063_v28 = vld [vmem:[#allocation8 + $0x20] ss:$16 sps:$4 sm:$0xff]   ;;  %v2064_v29 = vld [vmem:[#allocation8 + $0x28] ss:$16 sps:$4 sm:$0xff]   ;;  %v2065_v30 = vld [vmem:[#allocation8 + $0x4] ss:$16 sps:$4 sm:$0xff]  }
  0x70   : > { %v2067_v31 = vld [vmem:[#allocation8 + $0xc] ss:$16 sps:$4 sm:$0xff]   ;;  %v2069_v32 = vld [vmem:[#allocation8] ss:$16 sps:$4 sm:$0xff]   ;;  %v2070_v33 = vld [vmem:[#allocation8 + $0x8] ss:$16 sps:$4 sm:$0xff]  }
  0x71   : > { %553 = vmatpush1.bf16.msra.mxu0 %v2039_v12  ;;  %626 = vmatpush1.bf16.msra.mxu1 %v2040_v13  ;;  %v2584_v34 = vld [vmem:[#allocation10 + $0xe4] ss:$16 sps:$4 sm:$0xff]   ;;  %v2586_v35 = vld [vmem:[#allocation10 + $0xec] ss:$16 sps:$4 sm:$0xff]   ;;  %v2589_v37 = vld [vmem:[#allocation10 + $0xe0] ss:$16 sps:$4 sm:$0xff]  }
  0x72   : > { %554 = vmatprep.subr.bf16.mxu0 %v2041_v14  ;;  %627 = vmatprep.subr.bf16.mxu1 %v2043_v15  ;;  %v2071_v36 = vld [vmem:[%s2569_s1] sm:$0xff]   ;;  %v2591_v38 = vld [vmem:[#allocation10 + $0xe8] ss:$16 sps:$4 sm:$0xff]   ;;  %v2597_v40 = vld [vmem:[#allocation10 + $0xcc] ss:$16 sps:$4 sm:$0xff]   ;;  %v345_v11 = vshrl.u32 %v344_v10, 7 }
  0x73   : > { %v2595_v39 = vld [vmem:[#allocation10 + $0xc4] ss:$16 sps:$4 sm:$0xff]   ;;  %v2599_v41 = vld [vmem:[#allocation10 + $0xc0] ss:$16 sps:$4 sm:$0xff]   ;;  %v2603_v42 = vld [vmem:[#allocation10 + $0xc8] ss:$16 sps:$4 sm:$0xff]  }
  0x74   : > { %v2607_v43 = vld [vmem:[#allocation10 + $0xa4] ss:$16 sps:$4 sm:$0xff]   ;;  %v2609_v44 = vld [vmem:[#allocation10 + $0xac] ss:$16 sps:$4 sm:$0xff]   ;;  %v2614_v46 = vld [vmem:[#allocation10 + $0xa0] ss:$16 sps:$4 sm:$0xff]  }
  0x75   : > { %555 = vmatpush1.bf16.msra.mxu0 %v2045_v16  ;;  %628 = vmatpush1.bf16.msra.mxu1 %v2046_v17  ;;  %v2084_v45 = vld [vmem:[%s2569_s1 + $0x8] sm:$0xff]   ;;  %v2620_v48 = vld [vmem:[#allocation10 + $0x84] ss:$16 sps:$4 sm:$0xff]   ;;  %v2626_v50 = vld [vmem:[#allocation10 + $0x80] ss:$16 sps:$4 sm:$0xff]   ;;  %v346_v16 = vsub.s32 0, %v345_v11 }
  0x76   : > { %556 = vmatprep.subr.bf16.mxu0 %v2047_v18  ;;  %629 = vmatprep.subr.bf16.mxu1 %v2049_v19  ;;  %v2616_v47 = vld [vmem:[#allocation10 + $0xa8] ss:$16 sps:$4 sm:$0xff]   ;;  %v2624_v49 = vld [vmem:[#allocation10 + $0x8c] ss:$16 sps:$4 sm:$0xff]   ;;  %v2632_v52 = vld [vmem:[#allocation10 + $0x64] ss:$16 sps:$4 sm:$0xff]  }
  0x77   : > { %v2628_v51 = vld [vmem:[#allocation10 + $0x88] ss:$16 sps:$4 sm:$0xff]   ;;  %v2636_v53 = vld [vmem:[#allocation10 + $0x6c] ss:$16 sps:$4 sm:$0xff]   ;;  %v2097_v54 = vld [vmem:[%s2569_s1 + $0x10] sm:$0xff]   ;;  %v354_v17 = vsub.s32 2, %v345_v11 }
  0x78   : > { %v2643_v55 = vld [vmem:[#allocation10 + $0x60] ss:$16 sps:$4 sm:$0xff]   ;;  %v2645_v56 = vld [vmem:[#allocation10 + $0x68] ss:$16 sps:$4 sm:$0xff]   ;;  %v2649_v57 = vld [vmem:[#allocation10 + $0x44] ss:$16 sps:$4 sm:$0xff]  }
  0x79   : > { %557 = vmatpush1.bf16.msra.mxu0 %v2051_v20  ;;  %630 = vmatpush1.bf16.msra.mxu1 %v2052_v21  ;;  %v2651_v58 = vld [vmem:[#allocation10 + $0x4c] ss:$16 sps:$4 sm:$0xff]   ;;  %v2655_v59 = vld [vmem:[#allocation10 + $0x40] ss:$16 sps:$4 sm:$0xff]   ;;  %v2657_v60 = vld [vmem:[#allocation10 + $0x48] ss:$16 sps:$4 sm:$0xff]  }
  0x7a   : > { %558 = vmatprep.subr.bf16.mxu0 %v2053_v22  ;;  %631 = vmatprep.subr.bf16.mxu1 %v2055_v23  ;;  %v2661_v61 = vld [vmem:[#allocation10 + $0x24] ss:$16 sps:$4 sm:$0xff]   ;;  %v2663_v62 = vld [vmem:[#allocation10 + $0x2c] ss:$16 sps:$4 sm:$0xff]   ;;  %v2670_v0 = vld [vmem:[#allocation10 + $0x20] ss:$16 sps:$4 sm:$0xff]  }
  0x7b   : > { %v2110_v63 = vld [vmem:[%s2569_s1 + $0x18] sm:$0xff]   ;;  %v2676_v2 = vld [vmem:[#allocation10 + $0x4] ss:$16 sps:$4 sm:$0xff]   ;;  %v2680_v5 = vld [vmem:[#allocation10] ss:$16 sps:$4 sm:$0xff]   ;;  %v350_v21 = vsub.s32 1, %v345_v11 }
  0x7c   : > { %v2672_v1 = vld [vmem:[#allocation10 + $0x28] ss:$16 sps:$4 sm:$0xff]   ;;  %v2678_v4 = vld [vmem:[#allocation10 + $0xc] ss:$16 sps:$4 sm:$0xff]   ;;  %v758_v7 = vld [vmem:[#allocation3] sm:$0xff]  ;;  %v358_v22 = vsub.s32 3, %v345_v11 }
  0x7d   : > { %559 = vmatpush1.bf16.msra.mxu0 %v2057_v24  ;;  %632 = vmatpush1.bf16.msra.mxu1 %v2058_v25  ;;  %v2684_v6 = vld [vmem:[#allocation10 + $0x8] ss:$16 sps:$4 sm:$0xff]   ;;  %v342_v18 = vld [vmem:[%s2993_s3] sm:$0xf] }
  0x7e   : > { %560 = vmatprep.subr.bf16.mxu0 %v2059_v26  ;;  %633 = vmatprep.subr.bf16.mxu1 %v2061_v27  ;;  %v759_v8 = vld [vmem:[#allocation3 + $0x8] sm:$0xff]  ;;  %v347_v25 = vrot.slane %v342_v18, %v346_v16  ;;  %v2747_v26 = vrot.slane %v342_v18, %v354_v17 }
  0x7f   : > { %v773_v9 = vpack.c.bf16 %v759_v8, %v758_v7 }
  0x81   : > { %561 = vmatpush1.bf16.msra.mxu0 %v2063_v28  ;;  %634 = vmatpush1.bf16.msra.mxu1 %v2064_v29  ;;  %v351_v29 = vrot.slane %v342_v18, %v350_v21 }
  0x82   : > { %562 = vmatprep.subr.bf16.mxu0 %v2065_v30  ;;  %635 = vmatprep.subr.bf16.mxu1 %v2067_v31  ;;  %v2749_v30 = vrot.slane %v342_v18, %v358_v22 }
  0x85   : > { %563 = vmatpush1.bf16.msra.mxu0 %v2069_v32  ;;  %636 = vmatpush1.bf16.msra.mxu1 %v2070_v33 }
  0x86   : > { %934 = vmatprep.subr.bf16.mxu0 %v2584_v34  ;;  %977 = vmatprep.subr.bf16.mxu1 %v2586_v35 }
  0x88   : > { %581 = vmatmul.mubr.bf16.vlgmr.msra.gmra.mxu0 %v2071_v36  ;;  %654 = vmatmul.mubr.bf16.vlgmr.msra.gmra.mxu1 %v2071_v36 }
  0x89   : > { %935 = vmatpush1.bf16.msra.mxu0 %v2589_v37  ;;  %978 = vmatpush1.bf16.msra.mxu1 %v2591_v38 }
  0x8a   : > { %936 = vmatprep.subr.bf16.mxu0 %v2595_v39  ;;  %979 = vmatprep.subr.bf16.mxu1 %v2597_v40 }
  0x8b   : > { %590 = vmatprep.mubr.bf16.mxu0 %v3002_v3  ;;  %663 = vmatprep.mubr.bf16.mxu1 %v3002_v3 }
  0x8d   : > { %937 = vmatpush1.bf16.msra.mxu0 %v2599_v41  ;;  %980 = vmatpush1.bf16.msra.mxu1 %v2603_v42 }
  0x8e   : > { %938 = vmatprep.subr.bf16.mxu0 %v2607_v43  ;;  %981 = vmatprep.subr.bf16.mxu1 %v2609_v44 }
  0x90   : > { %591 = vmatmul.mubr.bf16.gmra.mxu0 %v2084_v45  ;;  %664 = vmatmul.mubr.bf16.gmra.mxu1 %v2084_v45 }
  0x91   : > { %939 = vmatpush1.bf16.msra.mxu0 %v2614_v46  ;;  %982 = vmatpush1.bf16.msra.mxu1 %v2616_v47 }
  0x92   : > { %940 = vmatprep.subr.bf16.mxu0 %v2620_v48  ;;  %983 = vmatprep.subr.bf16.mxu1 %v2624_v49 }
  0x93   : > { %600 = vmatprep.mubr.bf16.mxu0 %v3002_v3  ;;  %673 = vmatprep.mubr.bf16.mxu1 %v3002_v3 }
  0x95   : > { %941 = vmatpush1.bf16.msra.mxu0 %v2626_v50  ;;  %984 = vmatpush1.bf16.msra.mxu1 %v2628_v51 }
  0x96   : > { %942 = vmatprep.subr.bf16.mxu0 %v2632_v52  ;;  %985 = vmatprep.subr.bf16.mxu1 %v2636_v53 }
  0x98   : > { %601 = vmatmul.mubr.bf16.gmra.mxu0 %v2097_v54  ;;  %674 = vmatmul.mubr.bf16.gmra.mxu1 %v2097_v54 }
  0x99   : > { %943 = vmatpush1.bf16.msra.mxu0 %v2643_v55  ;;  %986 = vmatpush1.bf16.msra.mxu1 %v2645_v56 }
  0x9a   : > { %944 = vmatprep.subr.bf16.mxu0 %v2649_v57  ;;  %987 = vmatprep.subr.bf16.mxu1 %v2651_v58 }
  0x9b   : > { %610 = vmatprep.mubr.bf16.mxu0 %v3002_v3  ;;  %683 = vmatprep.mubr.bf16.mxu1 %v3002_v3 }
  0x9d   : > { %945 = vmatpush1.bf16.msra.mxu0 %v2655_v59  ;;  %988 = vmatpush1.bf16.msra.mxu1 %v2657_v60 }
  0x9e   : > { %946 = vmatprep.subr.bf16.mxu0 %v2661_v61  ;;  %989 = vmatprep.subr.bf16.mxu1 %v2663_v62 }
  0xa0   : > { %611 = vmatmul.mubr.bf16.gmra.mxu0 %v2110_v63  ;;  %684 = vmatmul.mubr.bf16.gmra.mxu1 %v2110_v63 }
  0xa1   : > { %947 = vmatpush1.bf16.msra.mxu0 %v2670_v0  ;;  %990 = vmatpush1.bf16.msra.mxu1 %v2672_v1 }
  0xa2   : > { %948 = vmatprep.subr.bf16.mxu0 %v2676_v2  ;;  %991 = vmatprep.subr.bf16.mxu1 %v2678_v4 }
  0xa3   : > { %966 = vmatprep.mubr.bf16.mxu0 %v3002_v3  ;;  %1009 = vmatprep.mubr.bf16.mxu1 %v3002_v3 }
  0xa5   : > { %949 = vmatpush1.bf16.msra.mxu0 %v2680_v5  ;;  %992 = vmatpush1.bf16.msra.mxu1 %v2684_v6 }
  0xa6   : > { %1097 = vmatprep.subr.bf16.mxu0 %v2584_v34  ;;  %1140 = vmatprep.subr.bf16.mxu1 %v2586_v35 }
  0xa8   : > { %967 = vmatmul.mubr.bf16.vlgmr.msra.gmra.mxu0 %v773_v9  ;;  %1010 = vmatmul.mubr.bf16.vlgmr.msra.gmra.mxu1 %v773_v9 }
  0xa9   : > { %1098 = vmatpush1.bf16.msra.mxu0 %v2589_v37  ;;  %1141 = vmatpush1.bf16.msra.mxu1 %v2591_v38 }
  0xaa   : > { %1099 = vmatprep.subr.bf16.mxu0 %v2595_v39  ;;  %1142 = vmatprep.subr.bf16.mxu1 %v2597_v40 }
  0xab   : > { %1129 = vmatprep.mubr.bf16.mxu0 %v3002_v3  ;;  %1172 = vmatprep.mubr.bf16.mxu1 %v3002_v3 }
  0xad   : > { %1100 = vmatpush1.bf16.msra.mxu0 %v2599_v41  ;;  %1143 = vmatpush1.bf16.msra.mxu1 %v2603_v42 }
  0xae   : > { %1101 = vmatprep.subr.bf16.mxu0 %v2607_v43  ;;  %1144 = vmatprep.subr.bf16.mxu1 %v2609_v44 }
  0xb1   : > { %1102 = vmatpush1.bf16.msra.mxu0 %v2614_v46  ;;  %1145 = vmatpush1.bf16.msra.mxu1 %v2616_v47 }
  0xb2   : > { %1103 = vmatprep.subr.bf16.mxu0 %v2620_v48  ;;  %1146 = vmatprep.subr.bf16.mxu1 %v2624_v49 }
  0xb5   : > { %1104 = vmatpush1.bf16.msra.mxu0 %v2626_v50  ;;  %1147 = vmatpush1.bf16.msra.mxu1 %v2628_v51 }
  0xb6   : > { %1105 = vmatprep.subr.bf16.mxu0 %v2632_v52  ;;  %1148 = vmatprep.subr.bf16.mxu1 %v2636_v53 }
  0xb9   : > { %1106 = vmatpush1.bf16.msra.mxu0 %v2643_v55  ;;  %1149 = vmatpush1.bf16.msra.mxu1 %v2645_v56 }
  0xba   : > { %1107 = vmatprep.subr.bf16.mxu0 %v2649_v57  ;;  %1150 = vmatprep.subr.bf16.mxu1 %v2651_v58 }
  0xbd   : > { %1108 = vmatpush1.bf16.msra.mxu0 %v2655_v59  ;;  %1151 = vmatpush1.bf16.msra.mxu1 %v2657_v60 }
  0xbe   : > { %1109 = vmatprep.subr.bf16.mxu0 %v2661_v61  ;;  %1152 = vmatprep.subr.bf16.mxu1 %v2663_v62 }
  0xc1   : > { %1110 = vmatpush1.bf16.msra.mxu0 %v2670_v0  ;;  %1153 = vmatpush1.bf16.msra.mxu1 %v2672_v1 }
  0xc2   : > { %1111 = vmatprep.subr.bf16.mxu0 %v2676_v2  ;;  %1154 = vmatprep.subr.bf16.mxu1 %v2678_v4 }
  0xc5   : > { %1112 = vmatpush1.bf16.msra.mxu0 %v2680_v5  ;;  %1155 = vmatpush1.bf16.msra.mxu1 %v2684_v6 }
  0xc6   : > { %1261 = vmatprep.subr.bf16.mxu0 %v2584_v34  ;;  %1304 = vmatprep.subr.bf16.mxu1 %v2586_v35 }
 0x148   : > { %v2728_v12 = vpop.f32.mrf.mxu0  ;;  %v2730_v13 = vpop.f32.mrf.mxu1 }
 0x14a   : > { %v2732_v14 = vpop.f32.mrf.mxu0  ;;  %v2734_v15 = vpop.f32.mrf.mxu1 }
 0x14c   : > { %v2739_v19 = vpop.f32.mrf.mxu0  ;;  %v2741_v20 = vpop.f32.mrf.mxu1 }
 0x14e   : > { %v2743_v23 = vpop.f32.mrf.mxu0  ;;  %v2745_v24 = vpop.f32.mrf.mxu1 }
 0x150   : > { %v592_v27 = vpop.f32.mrf.mxu0  ;;  %v665_v28 = vpop.f32.mrf.mxu1 }
 0x151   : > { %v2751_v31 = vadd.f32 %v592_v27, %v347_v25  ;;  %v2754_v32 = vadd.f32 %v665_v28, %v2747_v26 }
 0x152   : > { %v594_v33 = vpop.f32.mrf.mxu0  ;;  %v667_v36 = vpop.f32.mrf.mxu1 }
 0x153   : > { %3020 = vst [vmem:[#allocation23_spill] sm:$0xff] %v2754_v32  ;;  %v2756_v45 = vadd.f32 %v594_v33, %v351_v29  ;;  %v2759_v54 = vadd.f32 %v667_v36, %v2749_v30  ;;  %v589_v32 = vadd.f32 %v2743_v23, %v351_v29  ;;  %v662_v23 = vadd.f32 %v2745_v24, %v2749_v30 }
 0x154   : > { %v596_v63 = vpop.f32.mrf.mxu0  ;;  %v669_v7 = vpop.f32.mrf.mxu1 }
 0x155   : > { %3021 = vst [vmem:[#allocation24_spill] sm:$0xff] %v2759_v54  ;;  %v2761_v8 = vadd.f32 %v596_v63, %v347_v25  ;;  %v2764_v9 = vadd.f32 %v669_v7, %v2747_v26 }
 0x156   : > { %v598_v10 = vpop.f32.mrf.mxu0  ;;  %v671_v11 = vpop.f32.mrf.mxu1 }
 0x157   : > { %3022 = vst [vmem:[#allocation25_spill] sm:$0xff] %v2764_v9  ;;  %v2766_v16 = vadd.f32 %v598_v10, %v351_v29  ;;  %v2769_v17 = vadd.f32 %v671_v11, %v2749_v30 }
 0x158   : > { %v602_v18 = vpop.f32.mrf.mxu0  ;;  %v675_v21 = vpop.f32.mrf.mxu1 }
 0x159   : > { %3023 = vst [vmem:[#allocation26_spill] sm:$0xff] %v2769_v17  ;;  %v2771_v22 = vadd.f32 %v602_v18, %v347_v25  ;;  %v2774_v27 = vadd.f32 %v675_v21, %v2747_v26 }
 0x15a   : > { %v604_v28 = vpop.f32.mrf.mxu0  ;;  %v677_v33 = vpop.f32.mrf.mxu1 }
 0x15b   : > { %3024 = vst [vmem:[#allocation27_spill] sm:$0xff] %v2771_v22  ;;  %3025 = vst [vmem:[#allocation28_spill] sm:$0xff] %v2774_v27  ;;  %v2776_v36 = vadd.f32 %v604_v28, %v351_v29  ;;  %v2779_v63 = vadd.f32 %v677_v33, %v2749_v30 }
 0x15c   : > { %v606_v7 = vpop.f32.mrf.mxu0  ;;  %v679_v10 = vpop.f32.mrf.mxu1 }
 0x15d   : > { %3026 = vst [vmem:[#allocation29_spill] sm:$0xff] %v2776_v36  ;;  %3027 = vst [vmem:[#allocation30_spill] sm:$0xff] %v2779_v63  ;;  %v2781_v3 = vadd.f32 %v606_v7, %v347_v25  ;;  %v2784_v11 = vadd.f32 %v679_v10, %v2747_v26 }
 0x15e   : > { %v608_v9 = vpop.f32.mrf.mxu0  ;;  %v681_v18 = vpop.f32.mrf.mxu1 }
 0x15f   : > { %3028 = vst [vmem:[#allocation31_spill] sm:$0xff] %v2781_v3  ;;  %3029 = vst [vmem:[#allocation32_spill] sm:$0xff] %v2784_v11  ;;  %v2786_v22 = vadd.f32 %v608_v9, %v351_v29  ;;  %v2789_v21 = vadd.f32 %v681_v18, %v2749_v30 }
 0x160   : > { %v612_v27 = vpop.f32.mrf.mxu0  ;;  %v685_v28 = vpop.f32.mrf.mxu1 }
 0x161   : > { %3030 = vst [vmem:[#allocation33_spill] sm:$0xff] %v2786_v22  ;;  %3031 = vst [vmem:[#allocation34_spill] sm:$0xff] %v2789_v21  ;;  %v2791_v36 = vadd.f32 %v612_v27, %v347_v25  ;;  %v2794_v33 = vadd.f32 %v685_v28, %v2747_v26 }
 0x162   : > { %v614_v63 = vpop.f32.mrf.mxu0  ;;  %v687_v7 = vpop.f32.mrf.mxu1 }
 0x163   : > { %3032 = vst [vmem:[#allocation35_spill] sm:$0xff] %v2791_v36  ;;  %3033 = vst [vmem:[#allocation36_spill] sm:$0xff] %v2794_v33  ;;  %v2796_v3 = vadd.f32 %v614_v63, %v351_v29  ;;  %v2799_v10 = vadd.f32 %v687_v7, %v2749_v30  ;;  %v583_v36 = vadd.f32 %v2728_v12, %v347_v25 }
 0x164   : > { %v616_v11 = vpop.f32.mrf.mxu0  ;;  %v689_v9 = vpop.f32.mrf.mxu1  ;;  %v585_v7 = vadd.f32 %v2732_v14, %v351_v29 }
 0x165   : > { %3034 = vst [vmem:[#allocation37_spill] sm:$0xff] %v2796_v3  ;;  %3035 = vst [vmem:[#allocation38_spill] sm:$0xff] %v2799_v10  ;;  %v2801_v22 = vadd.f32 %v616_v11, %v347_v25  ;;  %v2804_v18 = vadd.f32 %v689_v9, %v2747_v26  ;;  %v587_v11 = vadd.f32 %v2739_v19, %v347_v25 }
 0x166   : > { %v618_v21 = vpop.f32.mrf.mxu0  ;;  %v691_v27 = vpop.f32.mrf.mxu1  ;;  %v658_v19 = vadd.f32 %v2734_v15, %v2749_v30 }
 0x167   : > { %3036 = vst [vmem:[#allocation39_spill] sm:$0xff] %v2801_v22  ;;  %3037 = vst [vmem:[#allocation40_spill] sm:$0xff] %v2804_v18  ;;  %v2807_v28 = vadd.f32 %v618_v21, %v351_v29  ;;  %v2810_v33 = vadd.f32 %v691_v27, %v2749_v30 }
 0x168   : > { %v968_v63 = vpop.f32.mrf.mxu0  ;;  %v1011_v3 = vpop.f32.mrf.mxu1 }
 0x169   : > { %3038 = vst [vmem:[#allocation41_spill] sm:$0xff] %v2807_v28  ;;  %3039 = vst [vmem:[#allocation42_spill] sm:$0xff] %v2810_v33  ;;  %v1020_v10 = vadd.f32 %v968_v63, %v583_v36 }
 0x16a   : > { %v970_v17 = vpop.f32.mrf.mxu0  ;;  %v1013_v21 = vpop.f32.mrf.mxu1 }
 0x16b   : > { %v1821_v22 = vmul.f32 -1.442695, %v1020_v10  ;;  %v1021_v9 = vadd.f32 %v970_v17, %v585_v7  ;;  %v656_v17 = vadd.f32 %v2730_v13, %v2747_v26  ;;  %v1023_v29 = vadd.f32 %v1013_v21, %v658_v19 }
 0x16c   : > { %v972_v18 = vpop.f32.mrf.mxu0  ;;  %v1015_v14 = vpop.f32.mrf.mxu1 }
 0x16d   : > { %2123 = vpow2.f32 %v1821_v22  ;;  %v1823_v12 = vmul.f32 -1.442695, %v1021_v9  ;;  %v1024_v28 = vadd.f32 %v972_v18, %v587_v11  ;;  %v1022_v22 = vadd.f32 %v1011_v3, %v656_v17  ;;  %v761_v17 = vld [vmem:[#allocation4] sm:$0xff] }
 0x16e   : > { %v974_v54 = vpop.f32.mrf.mxu0  ;;  %v1017_v25 = vpop.f32.mrf.mxu1 }
 0x16f   : > { %2125 = vpow2.f32 %v1823_v12  ;;  %v1822_v27 = vmul.f32 -1.442695, %v1024_v28  ;;  %v1025_v33 = vadd.f32 %v974_v54, %v589_v32  ;;  %v1027_v10 = vadd.f32 %v1017_v25, %v662_v23  ;;  %v760_v12 = vld [vmem:[#allocation4 + $0x8] sm:$0xff] }
 0x170   : > { %v1825_v28 = vmul.f32 -1.442695, %v1023_v29 }
 0x171   : > { %2127 = vpow2.f32 %v1822_v27  ;;  %v1824_v36 = vmul.f32 -1.442695, %v1025_v33  ;;  %v660_v33 = vadd.f32 %v2741_v20, %v2747_v26  ;;  %v1826_v63 = vmul.f32 -1.442695, %v1027_v10 }
 0x173   : > { %2129 = vpow2.f32 %v1824_v36  ;;  %v1026_v13 = vadd.f32 %v1015_v14, %v660_v33 }
 0x174   : > { %2131 = vtanh.f32 %v1022_v22 }
 0x17a   : > { %v2124_v18 = vpop.eup %2123 }
 0x17b   : > { %v1034_v32 = vadd.f32 1.0, %v2124_v18 }
 0x17c   : > { %v2126_v54 = vpop.eup %2125 }
 0x17d   : > { %2133 = vrcp.f32 %v1034_v32  ;;  %v1046_v15 = vadd.f32 1.0, %v2126_v54 }
 0x17e   : > { %v2128_v7 = vpop.eup %2127  ;;  %2135 = vpow2.f32 %v1825_v28 }
 0x17f   : > { %2137 = vrcp.f32 %v1046_v15  ;;  %v1035_v11 = vadd.f32 1.0, %v2128_v7 }
 0x180   : > { %v2130_v24 = vpop.eup %2129  ;;  %2139 = vpow2.f32 %v1826_v63 }
 0x181   : > { %2141 = vrcp.f32 %v1035_v11  ;;  %v1047_v3 = vadd.f32 1.0, %v2130_v24  ;;  %v2132_v30 = vpop.eup %2131  ;;  %v3040_v11 = vmov 0  }
 0x182   : > { %2143 = vtanh.f32 %v1026_v13 }
 0x183   : > { %2145 = vrcp.f32 %v1047_v3 }
 0x18a   : > { %v2134_v9 = vpop.eup %2133 }
 0x18b   : > { %v2136_v21 = vpop.eup %2135  ;;  %v1068_v27 = vmul.f32 %v2134_v9, %v2132_v30 }
 0x18c   : > { %v2138_v20 = vpop.eup %2137  ;;  %v1060_v25 = vadd.f32 1.0, %v2136_v21 }
 0x18d   : > { %v2140_v26 = vpop.eup %2139  ;;  %v1066_v36 = vmul.f32 %v2138_v20, %v760_v12 }
 0x18e   : > { %v2142_v19 = vpop.eup %2141  ;;  %v1061_v22 = vadd.f32 1.0, %v2140_v26  ;;  %2147 = vrcp.f32 %v1060_v25 }
 0x18f   : > { %v2144_v14 = vpop.eup %2143  ;;  %v2823_v23 = vadd.f32 %v1068_v27, %v1066_v36 }
 0x190   : > { %v2146_v29 = vpop.eup %2145  ;;  %v1069_v10 = vmul.f32 %v2144_v14, %v2142_v19 }
 0x191   : > { %v1067_v18 = vmul.f32 %v2146_v29, %v761_v17  ;;  %2149 = vtanh.f32 %v2823_v23 }
 0x192   : > { %2151 = vrcp.f32 %v1061_v22  ;;  %v3042_v22 = vld [vmem:[#allocation23_spill] sm:$0xff] }
 0x193   : > { %v2825_v28 = vadd.f32 %v1069_v10, %v1067_v18  ;;  %v3043_v18 = vld [vmem:[#allocation26_spill] sm:$0xff] }
 0x195   : > { %2153 = vtanh.f32 %v2825_v28 }
 0x19b   : > { %v2148_v32 = vpop.eup %2147 }
 0x19e   : > { %v2150_v54 = vpop.eup %2149 }
 0x19f   : > { %v2152_v33 = vpop.eup %2151  ;;  %v1074_v15 = vmul.f32 %v2150_v54, %v2148_v32 }
 0x1a2   : > { %v2154_v63 = vpop.eup %2153 }
 0x1a3   : > { %v1075_v7 = vmul.f32 %v2154_v63, %v2152_v33  ;;  %v3044_v33 = vld [vmem:[#allocation25_spill] sm:$0xff] }
 0x1a5   : > { %v1076_v13 = vpack.c.bf16 %v1075_v7, %v1074_v15 }
 0x1a7   : > { %1880 = vst [vmem:[%s2579_s21] sm:$0xff] %v1076_v13   ;;  %1130 = vmatmul.mubr.bf16.vlgmr.msra.gmra.mxu0 %v1076_v13  ;;  %1173 = vmatmul.mubr.bf16.vlgmr.msra.gmra.mxu1 %v1076_v13 }
 0x1a8   : > { %1262 = vmatpush1.bf16.msra.mxu0 %v2589_v37  ;;  %1305 = vmatpush1.bf16.msra.mxu1 %v2591_v38 }
 0x1a9   : > { %1263 = vmatprep.subr.bf16.mxu0 %v2595_v39  ;;  %1306 = vmatprep.subr.bf16.mxu1 %v2597_v40 }
 0x1aa   : > { %1293 = vmatprep.mubr.bf16.mxu0 %v3040_v11  ;;  %1336 = vmatprep.mubr.bf16.mxu1 %v3040_v11 }
 0x1ac   : > { %1264 = vmatpush1.bf16.msra.mxu0 %v2599_v41  ;;  %1307 = vmatpush1.bf16.msra.mxu1 %v2603_v42 }
 0x1ad   : > { %1265 = vmatprep.subr.bf16.mxu0 %v2607_v43  ;;  %1308 = vmatprep.subr.bf16.mxu1 %v2609_v44 }
 0x1b0   : > { %1266 = vmatpush1.bf16.msra.mxu0 %v2614_v46  ;;  %1309 = vmatpush1.bf16.msra.mxu1 %v2616_v47 }
 0x1b1   : > { %1267 = vmatprep.subr.bf16.mxu0 %v2620_v48  ;;  %1310 = vmatprep.subr.bf16.mxu1 %v2624_v49 }
 0x1b4   : > { %1268 = vmatpush1.bf16.msra.mxu0 %v2626_v50  ;;  %1311 = vmatpush1.bf16.msra.mxu1 %v2628_v51 }
 0x1b5   : > { %1269 = vmatprep.subr.bf16.mxu0 %v2632_v52  ;;  %1312 = vmatprep.subr.bf16.mxu1 %v2636_v53 }
 0x1b8   : > { %1270 = vmatpush1.bf16.msra.mxu0 %v2643_v55  ;;  %1313 = vmatpush1.bf16.msra.mxu1 %v2645_v56 }
 0x1b9   : > { %1271 = vmatprep.subr.bf16.mxu0 %v2649_v57  ;;  %1314 = vmatprep.subr.bf16.mxu1 %v2651_v58 }
 0x1bc   : > { %1272 = vmatpush1.bf16.msra.mxu0 %v2655_v59  ;;  %1315 = vmatpush1.bf16.msra.mxu1 %v2657_v60 }
 0x1bd   : > { %1273 = vmatprep.subr.bf16.mxu0 %v2661_v61  ;;  %1316 = vmatprep.subr.bf16.mxu1 %v2663_v62 }
 0x1c0   : > { %1274 = vmatpush1.bf16.msra.mxu0 %v2670_v0  ;;  %1317 = vmatpush1.bf16.msra.mxu1 %v2672_v1 }
 0x1c1   : > { %1275 = vmatprep.subr.bf16.mxu0 %v2676_v2  ;;  %1318 = vmatprep.subr.bf16.mxu1 %v2678_v4 }
 0x1c4   : > { %1276 = vmatpush1.bf16.msra.mxu0 %v2680_v5  ;;  %1319 = vmatpush1.bf16.msra.mxu1 %v2684_v6 }
 0x1c5   : > { %1425 = vmatprep.subr.bf16.mxu0 %v2584_v34  ;;  %1468 = vmatprep.subr.bf16.mxu1 %v2586_v35 }
 0x267   : > { %v1131_v24 = vpop.f32.mrf.mxu0  ;;  %v1174_v30 = vpop.f32.mrf.mxu1 }
 0x268   : > { %v1183_v3 = vadd.f32 %v1131_v24, %v2751_v31  ;;  %v3041_v31 = vld [vmem:[#allocation24_spill] sm:$0xff] }
 0x269   : > { %v1133_v9 = vpop.f32.mrf.mxu0  ;;  %v1176_v27 = vpop.f32.mrf.mxu1 }
 0x26a   : > { %v1829_v12 = vmul.f32 -1.442695, %v1183_v3  ;;  %v1184_v21 = vadd.f32 %v1133_v9, %v2756_v45  ;;  %v1186_v14 = vadd.f32 %v1176_v27, %v3041_v31  ;;  %v1185_v45 = vadd.f32 %v1174_v30, %v3042_v22 }
 0x26b   : > { %v1135_v20 = vpop.f32.mrf.mxu0  ;;  %v1178_v35 = vpop.f32.mrf.mxu1 }
 0x26c   : > { %2155 = vpow2.f32 %v1829_v12  ;;  %v1831_v26 = vmul.f32 -1.442695, %v1184_v21  ;;  %v1187_v36 = vadd.f32 %v1135_v20, %v2761_v8  ;;  %v1833_v10 = vmul.f32 -1.442695, %v1186_v14 }
 0x26d   : > { %v1137_v19 = vpop.f32.mrf.mxu0  ;;  %v1180_v29 = vpop.f32.mrf.mxu1  ;;  %v1189_v8 = vadd.f32 %v1178_v35, %v3044_v33 }
 0x26e   : > { %2157 = vpow2.f32 %v1831_v26  ;;  %v1830_v25 = vmul.f32 -1.442695, %v1187_v36  ;;  %v1188_v34 = vadd.f32 %v1137_v19, %v2766_v16  ;;  %v1190_v32 = vadd.f32 %v1180_v29, %v3043_v18 }
 0x270   : > { %2159 = vpow2.f32 %v1830_v25  ;;  %v1832_v17 = vmul.f32 -1.442695, %v1188_v34  ;;  %v1834_v16 = vmul.f32 -1.442695, %v1190_v32 }
 0x272   : > { %2161 = vpow2.f32 %v1832_v17 }
 0x273   : > { %2163 = vtanh.f32 %v1185_v45 }
 0x274   : > { %2165 = vpow2.f32 %v1833_v10 }
 0x279   : > { %v2156_v54 = vpop.eup %2155 }
 0x27a   : > { %v1197_v63 = vadd.f32 1.0, %v2156_v54 }
 0x27b   : > { %v2158_v15 = vpop.eup %2157 }
 0x27c   : > { %2167 = vrcp.f32 %v1197_v63  ;;  %v1209_v7 = vadd.f32 1.0, %v2158_v15 }
 0x27d   : > { %v2160_v13 = vpop.eup %2159  ;;  %2169 = vtanh.f32 %v1189_v8 }
 0x27e   : > { %2171 = vrcp.f32 %v1209_v7  ;;  %v1198_v24 = vadd.f32 1.0, %v2160_v13 }
 0x27f   : > { %v2162_v3 = vpop.eup %2161  ;;  %2173 = vpow2.f32 %v1834_v16 }
 0x280   : > { %2175 = vrcp.f32 %v1198_v24  ;;  %v1210_v30 = vadd.f32 1.0, %v2162_v3  ;;  %v2164_v9 = vpop.eup %2163 }
 0x281   : > { %v2166_v12 = vpop.eup %2165 }
 0x282   : > { %2177 = vrcp.f32 %v1210_v30  ;;  %v1223_v34 = vadd.f32 1.0, %v2166_v12 }
 0x284   : > { %2179 = vrcp.f32 %v1223_v34 }
 0x289   : > { %v2168_v21 = vpop.eup %2167 }
 0x28a   : > { %v2170_v20 = vpop.eup %2169  ;;  %v1231_v26 = vmul.f32 %v2168_v21, %v2164_v9 }
 0x28b   : > { %v2172_v27 = vpop.eup %2171 }
 0x28c   : > { %v2174_v36 = vpop.eup %2173  ;;  %v1229_v19 = vmul.f32 %v2172_v27, %v2823_v23 }
 0x28d   : > { %v2176_v25 = vpop.eup %2175  ;;  %v1224_v14 = vadd.f32 1.0, %v2174_v36 }
 0x28e   : > { %v2873_v35 = vadd.f32 %v1231_v26, %v1229_v19  ;;  %v1232_v17 = vmul.f32 %v2176_v25, %v2170_v20 }
 0x28f   : > { %v2178_v31 = vpop.eup %2177 }
 0x290   : > { %v1230_v29 = vmul.f32 %v2178_v31, %v2825_v28  ;;  %2181 = vtanh.f32 %v2873_v35 }
 0x291   : > { %2183 = vrcp.f32 %v1224_v14  ;;  %v2180_v45 = vpop.eup %2179 }
 0x292   : > { %v2876_v22 = vadd.f32 %v1232_v17, %v1230_v29 }
 0x294   : > { %2185 = vtanh.f32 %v2876_v22 }
 0x29d   : > { %v2182_v23 = vpop.eup %2181 }
 0x29e   : > { %v2184_v10 = vpop.eup %2183  ;;  %v1237_v32 = vmul.f32 %v2182_v23, %v2180_v45 }
 0x2a1   : > { %v2186_v18 = vpop.eup %2185 }
 0x2a2   : > { %v1238_v54 = vmul.f32 %v2186_v18, %v2184_v10 }
 0x2a4   : > { %v1239_v33 = vpack.c.bf16 %v1238_v54, %v1237_v32 }
 0x2a6   : > { %1896 = vst [vmem:[%s2579_s21 + $0x8] sm:$0xff] %v1239_v33   ;;  %1294 = vmatmul.mubr.bf16.vlgmr.msra.gmra.mxu0 %v1239_v33  ;;  %1337 = vmatmul.mubr.bf16.vlgmr.msra.gmra.mxu1 %v1239_v33 }
 0x2a7   : > { %1426 = vmatpush1.bf16.msra.mxu0 %v2589_v37  ;;  %1469 = vmatpush1.bf16.msra.mxu1 %v2591_v38  ;;  %v3045_v38 = vld [vmem:[#allocation27_spill] sm:$0xff] }
 0x2a8   : > { %1427 = vmatprep.subr.bf16.mxu0 %v2595_v39  ;;  %1470 = vmatprep.subr.bf16.mxu1 %v2597_v40 }
 0x2a9   : > { %1457 = vmatprep.mubr.bf16.mxu0 %v3040_v11  ;;  %1500 = vmatprep.mubr.bf16.mxu1 %v3040_v11 }
 0x2ab   : > { %1428 = vmatpush1.bf16.msra.mxu0 %v2599_v41  ;;  %1471 = vmatpush1.bf16.msra.mxu1 %v2603_v42 }
 0x2ac   : > { %1429 = vmatprep.subr.bf16.mxu0 %v2607_v43  ;;  %1472 = vmatprep.subr.bf16.mxu1 %v2609_v44  ;;  %v3046_v43 = vld [vmem:[#allocation29_spill] sm:$0xff] }
 0x2af   : > { %1430 = vmatpush1.bf16.msra.mxu0 %v2614_v46  ;;  %1473 = vmatpush1.bf16.msra.mxu1 %v2616_v47 }
 0x2b0   : > { %1431 = vmatprep.subr.bf16.mxu0 %v2620_v48  ;;  %1474 = vmatprep.subr.bf16.mxu1 %v2624_v49  ;;  %v3047_v49 = vld [vmem:[#allocation31_spill] sm:$0xff] }
 0x2b3   : > { %1432 = vmatpush1.bf16.msra.mxu0 %v2626_v50  ;;  %1475 = vmatpush1.bf16.msra.mxu1 %v2628_v51 }
 0x2b4   : > { %1433 = vmatprep.subr.bf16.mxu0 %v2632_v52  ;;  %1476 = vmatprep.subr.bf16.mxu1 %v2636_v53  ;;  %v3048_v53 = vld [vmem:[#allocation33_spill] sm:$0xff] }
 0x2b7   : > { %1434 = vmatpush1.bf16.msra.mxu0 %v2643_v55  ;;  %1477 = vmatpush1.bf16.msra.mxu1 %v2645_v56 }
 0x2b8   : > { %1435 = vmatprep.subr.bf16.mxu0 %v2649_v57  ;;  %1478 = vmatprep.subr.bf16.mxu1 %v2651_v58  ;;  %v3049_v58 = vld [vmem:[#allocation30_spill] sm:$0xff] }
 0x2bb   : > { %1436 = vmatpush1.bf16.msra.mxu0 %v2655_v59  ;;  %1479 = vmatpush1.bf16.msra.mxu1 %v2657_v60 }
 0x2bc   : > { %1437 = vmatprep.subr.bf16.mxu0 %v2661_v61  ;;  %1480 = vmatprep.subr.bf16.mxu1 %v2663_v62  ;;  %v3050_v61 = vld [vmem:[#allocation28_spill] sm:$0xff] }
 0x2bf   : > { %1438 = vmatpush1.bf16.msra.mxu0 %v2670_v0  ;;  %1481 = vmatpush1.bf16.msra.mxu1 %v2672_v1  ;;  %v3051_v1 = vld [vmem:[#allocation34_spill] sm:$0xff] }
 0x2c0   : > { %1439 = vmatprep.subr.bf16.mxu0 %v2676_v2  ;;  %1482 = vmatprep.subr.bf16.mxu1 %v2678_v4 }
 0x2c3   : > { %1440 = vmatpush1.bf16.msra.mxu0 %v2680_v5  ;;  %1483 = vmatpush1.bf16.msra.mxu1 %v2684_v6  ;;  %v3052_v5 = vld [vmem:[#allocation32_spill] sm:$0xff] }
 0x366   : > { %v1295_v37 = vpop.f32.mrf.mxu0  ;;  %v1338_v40 = vpop.f32.mrf.mxu1 }
 0x367   : > { %v1347_v39 = vadd.f32 %v1295_v37, %v3045_v38  ;;  %v1349_v62 = vadd.f32 %v1338_v40, %v3050_v61  ;;  %v3054_v40 = vld [vmem:[#allocation37_spill] sm:$0xff]  ;;  %v3059_v61 = vld [vmem:[#allocation42_spill] sm:$0xff] }
 0x368   : > { %v1297_v41 = vpop.f32.mrf.mxu0  ;;  %v1340_v48 = vpop.f32.mrf.mxu1 }
 0x369   : > { %v1839_v42 = vmul.f32 -1.442695, %v1347_v39  ;;  %v1348_v44 = vadd.f32 %v1297_v41, %v3046_v43  ;;  %v1350_v59 = vadd.f32 %v1340_v48, %v3049_v58  ;;  %v3058_v58 = vld [vmem:[#allocation36_spill] sm:$0xff] }
 0x36a   : > { %v1299_v46 = vpop.f32.mrf.mxu0  ;;  %v1342_v56 = vpop.f32.mrf.mxu1 }
 0x36b   : > { %2187 = vpow2.f32 %v1839_v42  ;;  %v1841_v47 = vmul.f32 -1.442695, %v1348_v44  ;;  %v1351_v50 = vadd.f32 %v1299_v46, %v3047_v49  ;;  %v1843_v0 = vmul.f32 -1.442695, %v1350_v59  ;;  %v3055_v46 = vld [vmem:[#allocation39_spill] sm:$0xff] }
 0x36c   : > { %v1301_v51 = vpop.f32.mrf.mxu0  ;;  %v1344_v60 = vpop.f32.mrf.mxu1  ;;  %v1353_v6 = vadd.f32 %v1342_v56, %v3052_v5 }
 0x36d   : > { %2189 = vpow2.f32 %v1841_v47  ;;  %v1840_v52 = vmul.f32 -1.442695, %v1351_v50  ;;  %v1352_v55 = vadd.f32 %v1301_v51, %v3048_v53  ;;  %v1354_v2 = vadd.f32 %v1344_v60, %v3051_v1  ;;  %v3056_v50 = vld [vmem:[#allocation41_spill] sm:$0xff]  ;;  %v3060_v1 = vld [vmem:[#allocation40_spill] sm:$0xff] }
 0x36f   : > { %2191 = vpow2.f32 %v1840_v52  ;;  %v1842_v57 = vmul.f32 -1.442695, %v1352_v55  ;;  %v1844_v8 = vmul.f32 -1.442695, %v1354_v2  ;;  %v3057_v55 = vld [vmem:[#allocation38_spill] sm:$0xff] }
 0x371   : > { %2193 = vpow2.f32 %v1842_v57 }
 0x372   : > { %2195 = vtanh.f32 %v1349_v62 }
 0x373   : > { %2197 = vpow2.f32 %v1843_v0 }
 0x378   : > { %v2188_v4 = vpop.eup %2187 }
 0x379   : > { %v1361_v28 = vadd.f32 1.0, %v2188_v4 }
 0x37a   : > { %v2190_v11 = vpop.eup %2189 }
 0x37b   : > { %2199 = vrcp.f32 %v1361_v28  ;;  %v1373_v63 = vadd.f32 1.0, %v2190_v11 }
 0x37c   : > { %v2192_v15 = vpop.eup %2191  ;;  %2201 = vtanh.f32 %v1353_v6 }
 0x37d   : > { %2203 = vrcp.f32 %v1373_v63  ;;  %v1362_v16 = vadd.f32 1.0, %v2192_v15 }
 0x37e   : > { %v2194_v7 = vpop.eup %2193  ;;  %2205 = vpow2.f32 %v1844_v8 }
 0x37f   : > { %2207 = vrcp.f32 %v1362_v16  ;;  %v1374_v13 = vadd.f32 1.0, %v2194_v7  ;;  %v2196_v24 = vpop.eup %2195 }
 0x380   : > { %v2198_v3 = vpop.eup %2197 }
 0x381   : > { %2209 = vrcp.f32 %v1374_v13  ;;  %v1387_v36 = vadd.f32 1.0, %v2198_v3 }
 0x383   : > { %2211 = vrcp.f32 %v1387_v36 }
 0x388   : > { %v2200_v30 = vpop.eup %2199 }
 0x389   : > { %v2202_v9 = vpop.eup %2201  ;;  %v1395_v12 = vmul.f32 %v2200_v30, %v2196_v24 }
 0x38a   : > { %v2204_v21 = vpop.eup %2203 }
 0x38b   : > { %v2206_v20 = vpop.eup %2205  ;;  %v1393_v26 = vmul.f32 %v2204_v21, %v2873_v35 }
 0x38c   : > { %v2208_v27 = vpop.eup %2207  ;;  %v1388_v17 = vadd.f32 1.0, %v2206_v20 }
 0x38d   : > { %v2922_v19 = vadd.f32 %v1395_v12, %v1393_v26  ;;  %v1396_v25 = vmul.f32 %v2208_v27, %v2202_v9 }
 0x38e   : > { %v2210_v34 = vpop.eup %2209 }
 0x38f   : > { %v1394_v31 = vmul.f32 %v2210_v34, %v2876_v22  ;;  %2213 = vtanh.f32 %v2922_v19  ;;  %v3053_v22 = vld [vmem:[#allocation35_spill] sm:$0xff] }
 0x390   : > { %2215 = vrcp.f32 %v1388_v17  ;;  %v2212_v29 = vpop.eup %2211 }
 0x391   : > { %v2925_v14 = vadd.f32 %v1396_v25, %v1394_v31 }
 0x393   : > { %2217 = vtanh.f32 %v2925_v14 }
 0x39c   : > { %v2214_v35 = vpop.eup %2213 }
 0x39d   : > { %v2216_v45 = vpop.eup %2215  ;;  %v1401_v10 = vmul.f32 %v2214_v35, %v2212_v29 }
 0x3a0   : > { %v2218_v23 = vpop.eup %2217 }
 0x3a1   : > { %v1402_v18 = vmul.f32 %v2218_v23, %v2216_v45 }
 0x3a3   : > { %v1403_v32 = vpack.c.bf16 %v1402_v18, %v1401_v10 }
 0x3a5   : > { %1897 = vst [vmem:[%s2579_s21 + $0x10] sm:$0xff] %v1403_v32   ;;  %1458 = vmatmul.mubr.bf16.vlgmr.msra.gmra.mxu0 %v1403_v32  ;;  %1501 = vmatmul.mubr.bf16.vlgmr.msra.gmra.mxu1 %v1403_v32 }
 0x465   : > { %v1459_v54 = vpop.f32.mrf.mxu0  ;;  %v1502_v37 = vpop.f32.mrf.mxu1 }
 0x466   : > { %v1511_v33 = vadd.f32 %v1459_v54, %v3053_v22  ;;  %v1513_v59 = vadd.f32 %v1502_v37, %v3058_v58 }
 0x467   : > { %v1461_v38 = vpop.f32.mrf.mxu0  ;;  %v1504_v44 = vpop.f32.mrf.mxu1 }
 0x468   : > { %v1849_v39 = vmul.f32 -1.442695, %v1511_v33  ;;  %v1512_v41 = vadd.f32 %v1461_v38, %v3054_v40  ;;  %v1514_v56 = vadd.f32 %v1504_v44, %v3057_v55 }
 0x469   : > { %v1463_v42 = vpop.f32.mrf.mxu0  ;;  %v1506_v52 = vpop.f32.mrf.mxu1 }
 0x46a   : > { %2219 = vpow2.f32 %v1849_v39  ;;  %v1851_v43 = vmul.f32 -1.442695, %v1512_v41  ;;  %v1515_v47 = vadd.f32 %v1463_v42, %v3055_v46  ;;  %v1853_v60 = vmul.f32 -1.442695, %v1514_v56 }
 0x46b   : > { %v1465_v48 = vpop.f32.mrf.mxu0  ;;  %v1508_v57 = vpop.f32.mrf.mxu1  ;;  %v1517_v2 = vadd.f32 %v1506_v52, %v3060_v1 }
 0x46c   : > { %2221 = vpow2.f32 %v1851_v43  ;;  %v1850_v49 = vmul.f32 -1.442695, %v1515_v47  ;;  %v1516_v51 = vadd.f32 %v1465_v48, %v3056_v50  ;;  %v1518_v62 = vadd.f32 %v1508_v57, %v3059_v61 }
 0x46e   : > { %2223 = vpow2.f32 %v1850_v49  ;;  %v1852_v53 = vmul.f32 -1.442695, %v1516_v51  ;;  %v1854_v6 = vmul.f32 -1.442695, %v1518_v62 }
 0x470   : > { %2225 = vpow2.f32 %v1852_v53 }
 0x471   : > { %2227 = vtanh.f32 %v1513_v59 }
 0x472   : > { %2229 = vpow2.f32 %v1853_v60 }
 0x477   : > { %v2220_v0 = vpop.eup %2219 }
 0x478   : > { %v1525_v4 = vadd.f32 1.0, %v2220_v0 }
 0x479   : > { %v2222_v5 = vpop.eup %2221 }
 0x47a   : > { %2231 = vrcp.f32 %v1525_v4  ;;  %v1537_v28 = vadd.f32 1.0, %v2222_v5 }
 0x47b   : > { %v2224_v11 = vpop.eup %2223  ;;  %2233 = vtanh.f32 %v1517_v2 }
 0x47c   : > { %2235 = vrcp.f32 %v1537_v28  ;;  %v1526_v8 = vadd.f32 1.0, %v2224_v11 }
 0x47d   : > { %v2226_v63 = vpop.eup %2225  ;;  %2237 = vpow2.f32 %v1854_v6 }
 0x47e   : > { %2239 = vrcp.f32 %v1526_v8  ;;  %v1538_v15 = vadd.f32 1.0, %v2226_v63  ;;  %v2228_v16 = vpop.eup %2227 }
 0x47f   : > { %v2230_v7 = vpop.eup %2229 }
 0x480   : > { %2241 = vrcp.f32 %v1538_v15  ;;  %v1551_v9 = vadd.f32 1.0, %v2230_v7 }
 0x482   : > { %2243 = vrcp.f32 %v1551_v9 }
 0x487   : > { %v2232_v13 = vpop.eup %2231 }
 0x488   : > { %v2234_v24 = vpop.eup %2233  ;;  %v1559_v3 = vmul.f32 %v2232_v13, %v2228_v16 }
 0x489   : > { %v2236_v30 = vpop.eup %2235 }
 0x48a   : > { %v2238_v12 = vpop.eup %2237  ;;  %v1557_v21 = vmul.f32 %v2236_v30, %v2922_v19 }
 0x48b   : > { %v2240_v20 = vpop.eup %2239  ;;  %v1552_v25 = vadd.f32 1.0, %v2238_v12 }
 0x48c   : > { %v1561_v26 = vadd.f32 %v1559_v3, %v1557_v21  ;;  %v1560_v27 = vmul.f32 %v2240_v20, %v2234_v24 }
 0x48d   : > { %v2242_v36 = vpop.eup %2241 }
 0x48e   : > { %2245 = vtanh.f32 %v1561_v26  ;;  %1580 = vst [vmem:[#allocation4 + $0x8] sm:$0xff] %v1561_v26  ;;  %v1558_v34 = vmul.f32 %v2242_v36, %v2925_v14 }
 0x48f   : > { %2247 = vrcp.f32 %v1552_v25  ;;  %v2244_v31 = vpop.eup %2243 }
 0x490   : > { %v1562_v17 = vadd.f32 %v1560_v27, %v1558_v34 }
 0x492   : > { %2249 = vtanh.f32 %v1562_v17  ;;  %1581 = vst [vmem:[#allocation4] sm:$0xff] %v1562_v17 }
 0x49b   : > { %v2246_v29 = vpop.eup %2245 }
 0x49c   : > { %v1565_v35 = vmul.f32 %v2246_v29, %v2244_v31  ;;  %v2248_v19 = vpop.eup %2247 }
 0x49e   : > { %1578 = vst [vmem:[#allocation3] sm:$0xff] %v1565_v35 }
 0x49f   : > { %v2250_v45 = vpop.eup %2249 }
 0x4a0   : > { %v1566_v23 = vmul.f32 %v2250_v45, %v2248_v19 }
 0x4a2   : > { %v1894_v10 = vpack.c.bf16 %v1566_v23, %v1565_v35  ;;  %1579 = vst [vmem:[#allocation3 + $0x8] sm:$0xff] %v1566_v23 }
 0x4a4   : > { %1898 = vst [vmem:[%s2579_s21 + $0x18] sm:$0xff] %v1894_v10  }
 0x4a5   : > { %s1861_s11 = sshll.u32 %s2365_s19, 1  ;;  %s1875_s13 = sshll.u32 %s2361_s18, 4 }
 0x4a6   : > { %s1596_s26 = sadd.s32 %s1875_s13, %s1861_s11  ;;  %s1609_s27 = sshll.u32 %s2579_s21, 4  ;;  %s1610_s27 = int_to_ptr.vmem [resolvable:$true] %s1609_s27 }
 0x4a7   : > { %s1863_s12 = sshll.u32 %s1596_s26, 6  ;;  %s2391_s7 = smov 128  }
 0x4a8   : > { %s1598_s28 = scalar_lea.hbm %s2994_s4, %s1863_s12  ;;  %p3061_p9 = scmp.ne.s32.totalorder %s3012_s6, 0 }
 0x4a9   : > { %s2392_s2 = smov 256   ;;  %s2393_s25 = smov 2  }
 0x4aa   : > { %1916 = sst [smem:[#allocation15]] (%p3061_p9), %s2391_s7  ;;  %s2394_s18 = smov 64  }
 0x4ab   : > { %1917 = sst [smem:[#allocation15 + $0x1]] (%p3061_p9), %s2392_s2  ;;  %s2395_s19 = smov 4  }
 0x4ac   : > { %1918 = sst [smem:[#allocation15 + $0x2]] (%p3061_p9), %s2393_s25  ;;  %s2396_s24 = smov 131072  }
 0x4ad   : > { %1919 = sst [smem:[#allocation15 + $0x3]] (%p3061_p9), %s2394_s18  ;;  %s2397_s8 = smov 0  }
 0x4ae   : > { %1920 = sst [smem:[#allocation15 + $0x4]] (%p3061_p9), %s2394_s18 }
 0x4af   : > { %1921 = sst [smem:[#allocation15 + $0x5]] (%p3061_p9), %s2395_s19 }
 0x4b0   : > { %1922 = dma.general (%p3061_p9), %s1610_s27, 512, %s1598_s28, %s1583_s5, %s2396_s24, [#allocation15], %s2397_s8, 0  }
 0x4b1 PF: > { %p1939_p2 = scmp.ge.s32.totalorder %s2377_s22, 2  ;;  %s1637_s1 = sand.u32 1, %s2349_s15  }
 0x4b2   : > { %p3062_p4 = scmp.ne.s32.totalorder %s3013_s9, 0  ;;  %s1638_s21 = scalar_lea.sflag [#allocation7], %s1637_s1 }
 0x4b4   : > { %p1932_p5 = pnand %p1939_p2, %p3062_p4 }
 0x4b6   : > { %p1933_p0 = pneg %p1932_p5 }
 0x4b8   : > { %2344 = dma.done.wait (%p1933_p0), %s1638_s21, 512  }
 0x4b9   : > { %2346 = vsyncadd (%p1933_p0), %s1638_s21, 4294966784  ;;  %s21_s22 = sadd.s32 1, %s2377_s22   ;;  %s3063_s19 = sld [smem:[#allocation20_spill]] }
 0x4ba   : > { %p18_p1 = scmp.ge.s32.totalorder %s21_s22, 8   ;;  %s3064_s6 = sld [smem:[#allocation21_spill]] }
 0x4bb   : > { %s3065_s21 = sld [smem:[#allocation22_spill]]  ;;  %s3066_s15 = smov %s2353_s16 }
 0x4bc   : > { %s3067_s16 = smov %s2357_s17  ;;  %s3068_s17 = smov %s2507_s10 }
 0x4bd   : > { %s3069_s18 = smov %s2369_s20  ;;  %20 = sbr.rel (!%p18_p1) target bundleno = 11 (0xb), region = 110 }
 0x4c0   : > { %s3070_s20 = smov %s3064_s6 }
 0x4c2   :  { %1643 = vsyncpa [#allocation6], 1 }
 0x4c3   :  { %1645 = vsyncpa [#allocation6 + $0x1], 1 }
 0x4c4   :  { %1646 = vsyncpa [#allocation9], 1 }
 0x4c5   :  { %1647 = vsyncpa [#allocation7], 1 }
 0x4c6   :  { %1649 = vsyncpa [#allocation7 + $0x1], 1 }

</bundles_post_ra>
